<compile_context>
chip_gen: v6e
topology: v6e:2x2x1
jax: 0.10.0
libtpu: 0.0.40
codegen_flags: <defaults>
</compile_context>

<pallas_src>
import functools

import jax
import jax.numpy as jnp
from jax import lax
from jax.experimental import pallas as pl
from jax.experimental.pallas import tpu as pltpu

BN_EPS = 1e-5


# --------------------------------------------------------------------------- #
# Kernel
# --------------------------------------------------------------------------- #
def resblock_kernel(a_ref, w1b_ref, w2b_ref,
                    f1_ref, p1_ref, f2_ref, p2_ref,
                    g1_ref, b1_ref, g2_ref, b2_ref,
                    out_ref, *, img_h):
    f32 = jnp.float32
    R, WC = a_ref.shape          # rows = N*H, lanes = C*W
    cdt = w1b_ref.dtype          # MXU compute dtype (bf16 or f32)

    a_f32 = a_ref[...]           # f32 copy; also reused for the residual add

    # Image-boundary masks for the +-1 row shifts (H-direction zero padding).
    y = lax.broadcasted_iota(jnp.int32, (R, WC), 0) % img_h
    not_top = y != 0             # row r-1 exists inside the same image
    not_bot = y != img_h - 1     # row r+1 exists inside the same image

    def row_conv(x_f32, wb_ref):
        # 3x3 conv as 3 MXU matmuls (one per dy) with K = W*Cin.  W-direction
        # zero padding is folded into the banded weights; H-direction padding
        # is pltpu.roll (XLU) + boundary select (VPU) — no shift matmuls.
        dn = jnp.where(not_top, pltpu.roll(x_f32, shift=1, axis=0), 0.0)      # r <- r-1
        up = jnp.where(not_bot, pltpu.roll(x_f32, shift=R - 1, axis=0), 0.0)  # r <- r+1
        acc = jnp.dot(dn.astype(cdt), wb_ref[0], preferred_element_type=f32)
        acc = acc + jnp.dot(x_f32.astype(cdt), wb_ref[1], preferred_element_type=f32)
        acc = acc + jnp.dot(up.astype(cdt), wb_ref[2], preferred_element_type=f32)
        return acc

    def batchnorm(acc, fold_ref, bcast_ref, g_ref, b_ref):
        # One-pass batch stats: per-lane sum / sum-of-squares over rows, then a
        # factored channel reduce: (2, CW) @ fold (CW, C) -> per-channel stats,
        # then @ bcast (C, CW) (includes 1/count) -> broadcast back to lanes.
        s = jnp.sum(acc, axis=0, keepdims=True)
        ss = jnp.sum(acc * acc, axis=0, keepdims=True)
        stats = jnp.concatenate([s, ss], axis=0)                     # (2, lanes)
        per_ch = jnp.dot(stats, fold_ref[...], preferred_element_type=f32,
                         precision=lax.Precision.HIGHEST)            # (2, C)
        lanes = jnp.dot(per_ch, bcast_ref[...], preferred_element_type=f32,
                        precision=lax.Precision.HIGHEST)             # (2, lanes)
        mean, ex2 = lanes[0:1, :], lanes[1:2, :]
        var = jnp.maximum(ex2 - mean * mean, 0.0)                    # cancellation guard
        inv = lax.rsqrt(var + BN_EPS)
        return (acc - mean) * (inv * g_ref[...]) + b_ref[...]

    # conv1 (C -> 2C) + BN(2C) + GLU
    acc1 = row_conv(a_f32, w1b_ref)                                  # (R, 2C*W)
    bn1 = batchnorm(acc1, f1_ref, p1_ref, g1_ref, b1_ref)
    glu = bn1[:, :WC] * jax.nn.sigmoid(bn1[:, WC:])                  # (R, C*W)

    # conv2 (C -> C) + BN(C) + residual
    acc2 = row_conv(glu, w2b_ref)                                    # (R, C*W)
    bn2 = batchnorm(acc2, f2_ref, p2_ref, g2_ref, b2_ref)
    out_ref[...] = (bn2 + a_f32).astype(out_ref.dtype)


# --------------------------------------------------------------------------- #
# Wrapper-side constant builders
# --------------------------------------------------------------------------- #
def _banded_conv_weights(w, W, dtype):
    """(Cout, Cin, 3, 3) -> (3, W*Cin, W*Cout) banded matrices, lane = c*W + x.

    wb[dy][ci*W + xin, co*W + xout] = w[co, ci, dy, xin - xout + 1] if |xin-xout|<=1
    else 0.  The off-diagonal eye truncation implements the W-direction zero pad.
    """
    mats = []
    for dy in range(3):
        m = 0.0
        for dx in range(3):
            shift = jnp.eye(W, k=1 - dx, dtype=jnp.float32)   # xin = xout + dx - 1
            m = m + jnp.kron(w[:, :, dy, dx].T.astype(jnp.float32), shift)
        mats.append(m)
    return jnp.stack(mats).astype(dtype)


def _bn_fold_bcast(C, W, count):
    """Factored BN channel averaging.

    fold  (C*W, C): sums the W lanes belonging to each channel.
    bcast (C, C*W): broadcasts the per-channel stat back to the lane layout,
                    with the 1/(N*H*W) normalization folded in.
    """
    eye = jnp.eye(C, dtype=jnp.float32)
    fold = jnp.kron(eye, jnp.ones((W, 1), jnp.float32))
    bcast = jnp.kron(eye, jnp.ones((1, W), jnp.float32)) / float(count)
    return fold, bcast


def _pick_vmem_limit(operand_bytes):
    """VMEM limit from the actual footprint, capped below device capacity."""
    cap = 64 * 1024 * 1024                      # conservative default (v7x per-core)
    try:
        cap = int(pltpu.get_tpu_info().vmem_capacity_bytes)
    except Exception:
        pass                                    # keep the conservative default
    want = max(16 * 1024 * 1024, 2 * int(operand_bytes))
    return int(min(want, cap - 8 * 1024 * 1024))


# --------------------------------------------------------------------------- #
# Public wrapper
# --------------------------------------------------------------------------- #
def resblock_pallas(x_nchw, w1, w2, g1, b1, g2, b2, *, mxu_dtype=jnp.bfloat16):
    N, C, H, W = x_nchw.shape
    R, CW = N * H, C * W
    count = N * H * W

    # Lane-dense layout: rows = (n, y), lanes = c*W + x (channel-major).
    a = jnp.transpose(x_nchw, (0, 2, 1, 3)).reshape(R, CW).astype(jnp.float32)

    w1b = _banded_conv_weights(w1, W, mxu_dtype)        # (3, C*W, 2C*W)
    w2b = _banded_conv_weights(w2, W, mxu_dtype)        # (3, C*W, C*W)
    f1, p1 = _bn_fold_bcast(2 * C, W, count)            # (2C*W, 2C), (2C, 2C*W)
    f2, p2 = _bn_fold_bcast(C, W, count)                # (C*W, C),  (C, C*W)
    g1l = jnp.repeat(g1.astype(jnp.float32), W).reshape(1, -1)
    b1l = jnp.repeat(b1.astype(jnp.float32), W).reshape(1, -1)
    g2l = jnp.repeat(g2.astype(jnp.float32), W).reshape(1, -1)
    b2l = jnp.repeat(b2.astype(jnp.float32), W).reshape(1, -1)

    inputs = (a, w1b, w2b, f1, p1, f2, p2, g1l, b1l, g2l, b2l)

    # Operand footprint + rough allowance for in-kernel f32 intermediates
    # (acc1/bn1 are (R, 2CW) f32; glu/acc2/bn2/masks are (R, CW)).
    operand_bytes = sum(int(t.size) * t.dtype.itemsize for t in inputs)
    operand_bytes += R * CW * 4                   # output
    operand_bytes += 16 * R * CW * 4              # intermediates headroom

    # Grid-less call: single invocation, every operand resident in VMEM (no
    # pipelining machinery, no dead double-buffers).  BN batch statistics
    # couple all rows, so row tiling would need a cross-tile stats pass (TODO).
    out2d = pl.pallas_call(
        functools.partial(resblock_kernel, img_h=H),
        out_shape=jax.ShapeDtypeStruct((R, CW), jnp.float32),
        compiler_params=pltpu.CompilerParams(
            vmem_limit_bytes=_pick_vmem_limit(operand_bytes)),
    )(*inputs)

    # Back to NCHW (required by the PyTorch module interface).
    # TODO(synk): keep the (R, C*W) layout between ResBlocks in a real model to
    #   avoid this per-call HBM round-trip transpose.
    return jnp.transpose(out2d.reshape(N, H, C, W), (0, 2, 1, 3))


# --------------------------------------------------------------------------- #
# Pure-JAX reference (mirrors the PyTorch module in training mode)
# --------------------------------------------------------------------------- #
def resblock_ref(x, w1, w2, g1, b1, g2, b2):
    def conv(inp, w):
        return lax.conv_general_dilated(
            inp, w, window_strides=(1, 1), padding=((1, 1), (1, 1)),
            dimension_numbers=('NCHW', 'OIHW', 'NCHW'))

    def bn(y, g, b):
        m = jnp.mean(y, axis=(0, 2, 3), keepdims=True)
        v = jnp.mean((y - m) ** 2, axis=(0, 2, 3), keepdims=True)
        return (y - m) / jnp.sqrt(v + BN_EPS) * g.reshape(1, -1, 1, 1) \
            + b.reshape(1, -1, 1, 1)

    C = x.shape[1]
    h = bn(conv(x, w1), g1, b1)
    h = h[:, :C] * jax.nn.sigmoid(h[:, C:])
    h = bn(conv(h, w2), g2, b2)
    return h + x


if __name__ == "__main__":
    N, C, H, W = 2, 4, 16, 16
    key = jax.random.PRNGKey(0)
    kx, kw1, kw2, kg1, kb1, kg2, kb2 = jax.random.split(key, 7)

    x = jax.random.normal(kx, (N, C, H, W), jnp.float32)
    # conv3x3(C, 2C) and conv3x3(C, C), bias=False
    w1 = 0.1 * jax.random.normal(kw1, (2 * C, C, 3, 3), jnp.float32)
    w2 = 0.1 * jax.random.normal(kw2, (C, C, 3, 3), jnp.float32)
    # BatchNorm affine params (deterministic, perturbed from default 1/0)
    g1 = 1.0 + 0.05 * jax.random.normal(kg1, (2 * C,), jnp.float32)
    b1 = 0.05 * jax.random.normal(kb1, (2 * C,), jnp.float32)
    g2 = 1.0 + 0.05 * jax.random.normal(kg2, (C,), jnp.float32)
    b2 = 0.05 * jax.random.normal(kb2, (C,), jnp.float32)

    resblock = jax.jit(resblock_pallas, static_argnames="mxu_dtype")
    ref = resblock_ref(x, w1, w2, g1, b1, g2, b2)

    # f32-MXU path: validates the whole formulation (banded conv, roll+mask
    # shifts, factored one-pass BN, GLU, residual) against the reference.
    out_f32 = jax.block_until_ready(
        resblock(x, w1, w2, g1, b1, g2, b2, mxu_dtype=jnp.float32))
    assert out_f32.shape == (N, C, H, W)
    err32 = jnp.max(jnp.abs(out_f32 - ref))
    assert jnp.allclose(out_f32, ref, atol=1e-3, rtol=1e-3), \
        f"f32 path max abs err {err32}"

    # bf16-MXU path (default perf configuration on v6e/v7x): loose sanity check.
    out_bf16 = jax.block_until_ready(resblock(x, w1, w2, g1, b1, g2, b2))
    err16 = jnp.max(jnp.abs(out_bf16 - ref))
    assert bool(jnp.all(jnp.isfinite(out_bf16))) and err16 < 0.5, \
        f"bf16 path max abs err {err16}"

    print("KERNEL_OK")
</pallas_src>

<mosaic_0001>
module attributes {stable_mosaic.version = 11 : i64} {
  func.func @resblock_kernel(%arg0: memref<32x64xf32, #tpu.memory_space<vmem>>, %arg1: memref<3x64x128xf32, #tpu.memory_space<vmem>>, %arg2: memref<3x64x64xf32, #tpu.memory_space<vmem>>, %arg3: memref<128x8xf32, #tpu.memory_space<vmem>>, %arg4: memref<8x128xf32, #tpu.memory_space<vmem>>, %arg5: memref<64x4xf32, #tpu.memory_space<vmem>>, %arg6: memref<4x64xf32, #tpu.memory_space<vmem>>, %arg7: memref<1x128xf32, #tpu.memory_space<vmem>>, %arg8: memref<1x128xf32, #tpu.memory_space<vmem>>, %arg9: memref<1x64xf32, #tpu.memory_space<vmem>>, %arg10: memref<1x64xf32, #tpu.memory_space<vmem>>, %arg11: memref<32x64xf32, #tpu.memory_space<vmem>>) attributes {dimension_semantics = [], scalar_prefetch = 0 : i64, scratch_operands = 0 : i64, tpu.core_type = #tpu.core_type<tc>} {
    %c0 = arith.constant 0 : index
    %c0_0 = arith.constant 0 : index
    %0 = vector.load %arg0[%c0, %c0_0] : memref<32x64xf32, #tpu.memory_space<vmem>>, vector<32x64xf32>
    %1 = tpu.iota {dimensions = array<i32: 0>} : vector<32x64xi32>
    %c16_i32 = arith.constant 16 : i32
    %c0_i32 = arith.constant 0 : i32
    %2 = arith.cmpi eq, %c16_i32, %c0_i32 : i32
    %c1_i32 = arith.constant 1 : i32
    %3 = arith.select %2, %c1_i32, %c16_i32 : i32
    %4 = vector.broadcast %3 : i32 to vector<32x64xi32>
    %5 = arith.remsi %1, %4 : vector<32x64xi32>
    %c0_i32_1 = arith.constant 0 : i32
    %6 = vector.broadcast %c0_i32_1 : i32 to vector<32x64xi32>
    %7 = arith.cmpi ne, %5, %6 : vector<32x64xi32>
    %c0_i32_2 = arith.constant 0 : i32
    %8 = vector.broadcast %c0_i32_2 : i32 to vector<32x64xi32>
    %9 = arith.cmpi slt, %5, %8 : vector<32x64xi32>
    %c0_i32_3 = arith.constant 0 : i32
    %10 = arith.cmpi slt, %3, %c0_i32_3 : i32
    %11 = vector.broadcast %10 : i1 to vector<32x64xi1>
    %12 = vector.broadcast %11 : vector<32x64xi1> to vector<32x64xi1>
    %13 = arith.xori %9, %12 : vector<32x64xi1>
    %14 = arith.andi %13, %7 : vector<32x64xi1>
    %15 = vector.broadcast %3 : i32 to vector<32x64xi32>
    %16 = arith.addi %5, %15 : vector<32x64xi32>
    %17 = arith.select %14, %16, %5 : vector<32x64xi1>, vector<32x64xi32>
    %c0_i32_4 = arith.constant 0 : i32
    %18 = vector.broadcast %c0_i32_4 : i32 to vector<32x64xi32>
    %19 = arith.cmpi ne, %17, %18 : vector<32x64xi32>
    %c15_i32 = arith.constant 15 : i32
    %20 = vector.broadcast %c15_i32 : i32 to vector<32x64xi32>
    %21 = arith.cmpi ne, %17, %20 : vector<32x64xi32>
    %c1_i32_5 = arith.constant 1 : i32
    %22 = tpu.dynamic_rotate %0 by %c1_i32_5 dim 0 : vector<32x64xf32>, i32 -> vector<32x64xf32>
    %cst = arith.constant 0.000000e+00 : f32
    %23 = vector.broadcast %cst : f32 to vector<32x64xf32>
    %24 = arith.select %19, %22, %23 : vector<32x64xi1>, vector<32x64xf32>
    %c31_i32 = arith.constant 31 : i32
    %25 = tpu.dynamic_rotate %0 by %c31_i32 dim 0 : vector<32x64xf32>, i32 -> vector<32x64xf32>
    %cst_6 = arith.constant 0.000000e+00 : f32
    %26 = vector.broadcast %cst_6 : f32 to vector<32x64xf32>
    %27 = arith.select %21, %25, %26 : vector<32x64xi1>, vector<32x64xf32>
    %c0_7 = arith.constant 0 : index
    %c0_8 = arith.constant 0 : index
    %c0_9 = arith.constant 0 : index
    %28 = vector.load %arg1[%c0_7, %c0_8, %c0_9] : memref<3x64x128xf32, #tpu.memory_space<vmem>>, vector<1x64x128xf32>
    %29 = vector.shape_cast %28 : vector<1x64x128xf32> to vector<64x128xf32>
    %cst_10 = arith.constant dense<0.000000e+00> : vector<32x128xf32>
    %30 = tpu.matmul %24, %29, %cst_10 {dimension_numbers = #tpu.dot_dimension_numbers<[1], [0], [0], [1], [0, 0, 1, 1], [], []>} : vector<32x64xf32>, vector<64x128xf32>, vector<32x128xf32> -> vector<32x128xf32>
    %c1 = arith.constant 1 : index
    %c0_11 = arith.constant 0 : index
    %c0_12 = arith.constant 0 : index
    %31 = vector.load %arg1[%c1, %c0_11, %c0_12] : memref<3x64x128xf32, #tpu.memory_space<vmem>>, vector<1x64x128xf32>
    %32 = vector.shape_cast %31 : vector<1x64x128xf32> to vector<64x128xf32>
    %cst_13 = arith.constant dense<0.000000e+00> : vector<32x128xf32>
    %33 = tpu.matmul %0, %32, %cst_13 {dimension_numbers = #tpu.dot_dimension_numbers<[1], [0], [0], [1], [0, 0, 1, 1], [], []>} : vector<32x64xf32>, vector<64x128xf32>, vector<32x128xf32> -> vector<32x128xf32>
    %34 = arith.addf %30, %33 : vector<32x128xf32>
    %c2 = arith.constant 2 : index
    %c0_14 = arith.constant 0 : index
    %c0_15 = arith.constant 0 : index
    %35 = vector.load %arg1[%c2, %c0_14, %c0_15] : memref<3x64x128xf32, #tpu.memory_space<vmem>>, vector<1x64x128xf32>
    %36 = vector.shape_cast %35 : vector<1x64x128xf32> to vector<64x128xf32>
    %cst_16 = arith.constant dense<0.000000e+00> : vector<32x128xf32>
    %37 = tpu.matmul %27, %36, %cst_16 {dimension_numbers = #tpu.dot_dimension_numbers<[1], [0], [0], [1], [0, 0, 1, 1], [], []>} : vector<32x64xf32>, vector<64x128xf32>, vector<32x128xf32> -> vector<32x128xf32>
    %38 = arith.addf %34, %37 : vector<32x128xf32>
    %cst_17 = arith.constant dense<0.000000e+00> : vector<128xf32>
    %39 = vector.multi_reduction <add>, %38, %cst_17 [0] : vector<32x128xf32> to vector<128xf32>
    %40 = vector.shape_cast %39 : vector<128xf32> to vector<1x128xf32>
    %41 = arith.mulf %38, %38 : vector<32x128xf32>
    %cst_18 = arith.constant dense<0.000000e+00> : vector<128xf32>
    %42 = vector.multi_reduction <add>, %41, %cst_18 [0] : vector<32x128xf32> to vector<128xf32>
    %43 = vector.shape_cast %42 : vector<128xf32> to vector<1x128xf32>
    %44 = tpu.concatenate %40, %43 in 0 : vector<1x128xf32>, vector<1x128xf32> -> vector<2x128xf32>
    %c0_19 = arith.constant 0 : index
    %c0_20 = arith.constant 0 : index
    %45 = vector.load %arg3[%c0_19, %c0_20] : memref<128x8xf32, #tpu.memory_space<vmem>>, vector<128x8xf32>
    %cst_21 = arith.constant dense<0.000000e+00> : vector<2x8xf32>
    %46 = tpu.matmul %44, %45, %cst_21 {dimension_numbers = #tpu.dot_dimension_numbers<[1], [0], [0], [1], [0, 0, 1, 1], [], []>, precision = #tpu.contract_precision<fp32>} : vector<2x128xf32>, vector<128x8xf32>, vector<2x8xf32> -> vector<2x8xf32>
    %c0_22 = arith.constant 0 : index
    %c0_23 = arith.constant 0 : index
    %47 = vector.load %arg4[%c0_22, %c0_23] : memref<8x128xf32, #tpu.memory_space<vmem>>, vector<8x128xf32>
    %cst_24 = arith.constant dense<0.000000e+00> : vector<2x128xf32>
    %48 = tpu.matmul %46, %47, %cst_24 {dimension_numbers = #tpu.dot_dimension_numbers<[1], [0], [0], [1], [0, 0, 1, 1], [], []>, precision = #tpu.contract_precision<fp32>} : vector<2x8xf32>, vector<8x128xf32>, vector<2x128xf32> -> vector<2x128xf32>
    %49 = vector.extract_strided_slice %48 {offsets = [0, 0], sizes = [1, 128], strides = [1, 1]} : vector<2x128xf32> to vector<1x128xf32>
    %50 = vector.extract_strided_slice %48 {offsets = [1, 0], sizes = [1, 128], strides = [1, 1]} : vector<2x128xf32> to vector<1x128xf32>
    %51 = arith.mulf %49, %49 : vector<1x128xf32>
    %52 = arith.subf %50, %51 : vector<1x128xf32>
    %cst_25 = arith.constant 0.000000e+00 : f32
    %53 = vector.broadcast %cst_25 : f32 to vector<1x128xf32>
    %54 = arith.maximumf %52, %53 : vector<1x128xf32>
    %cst_26 = arith.constant 9.99999974E-6 : f32
    %55 = vector.broadcast %cst_26 : f32 to vector<1x128xf32>
    %56 = arith.addf %54, %55 : vector<1x128xf32>
    %57 = math.rsqrt %56 : vector<1x128xf32>
    %58 = vector.broadcast %49 : vector<1x128xf32> to vector<32x128xf32>
    %59 = arith.subf %38, %58 : vector<32x128xf32>
    %c0_27 = arith.constant 0 : index
    %c0_28 = arith.constant 0 : index
    %60 = vector.load %arg7[%c0_27, %c0_28] : memref<1x128xf32, #tpu.memory_space<vmem>>, vector<1x128xf32>
    %61 = arith.mulf %57, %60 : vector<1x128xf32>
    %62 = vector.broadcast %61 : vector<1x128xf32> to vector<32x128xf32>
    %63 = arith.mulf %59, %62 : vector<32x128xf32>
    %c0_29 = arith.constant 0 : index
    %c0_30 = arith.constant 0 : index
    %64 = vector.load %arg8[%c0_29, %c0_30] : memref<1x128xf32, #tpu.memory_space<vmem>>, vector<1x128xf32>
    %65 = vector.broadcast %64 : vector<1x128xf32> to vector<32x128xf32>
    %66 = arith.addf %63, %65 : vector<32x128xf32>
    %67 = vector.extract_strided_slice %66 {offsets = [0, 0], sizes = [32, 64], strides = [1, 1]} : vector<32x128xf32> to vector<32x64xf32>
    %68 = vector.extract_strided_slice %66 {offsets = [0, 64], sizes = [32, 64], strides = [1, 1]} : vector<32x128xf32> to vector<32x64xf32>
    %69 = arith.negf %68 : vector<32x64xf32>
    %70 = math.exp %69 : vector<32x64xf32>
    %cst_31 = arith.constant 1.000000e+00 : f32
    %71 = vector.broadcast %cst_31 : f32 to vector<32x64xf32>
    %72 = arith.addf %71, %70 : vector<32x64xf32>
    %73 = arith.divf %71, %72 : vector<32x64xf32>
    %74 = arith.mulf %67, %73 : vector<32x64xf32>
    %c1_i32_32 = arith.constant 1 : i32
    %75 = tpu.dynamic_rotate %74 by %c1_i32_32 dim 0 : vector<32x64xf32>, i32 -> vector<32x64xf32>
    %cst_33 = arith.constant 0.000000e+00 : f32
    %76 = vector.broadcast %cst_33 : f32 to vector<32x64xf32>
    %77 = arith.select %19, %75, %76 : vector<32x64xi1>, vector<32x64xf32>
    %c31_i32_34 = arith.constant 31 : i32
    %78 = tpu.dynamic_rotate %74 by %c31_i32_34 dim 0 : vector<32x64xf32>, i32 -> vector<32x64xf32>
    %cst_35 = arith.constant 0.000000e+00 : f32
    %79 = vector.broadcast %cst_35 : f32 to vector<32x64xf32>
    %80 = arith.select %21, %78, %79 : vector<32x64xi1>, vector<32x64xf32>
    %c0_36 = arith.constant 0 : index
    %c0_37 = arith.constant 0 : index
    %c0_38 = arith.constant 0 : index
    %81 = vector.load %arg2[%c0_36, %c0_37, %c0_38] : memref<3x64x64xf32, #tpu.memory_space<vmem>>, vector<1x64x64xf32>
    %82 = vector.shape_cast %81 : vector<1x64x64xf32> to vector<64x64xf32>
    %cst_39 = arith.constant dense<0.000000e+00> : vector<32x64xf32>
    %83 = tpu.matmul %77, %82, %cst_39 {dimension_numbers = #tpu.dot_dimension_numbers<[1], [0], [0], [1], [0, 0, 1, 1], [], []>} : vector<32x64xf32>, vector<64x64xf32>, vector<32x64xf32> -> vector<32x64xf32>
    %c1_40 = arith.constant 1 : index
    %c0_41 = arith.constant 0 : index
    %c0_42 = arith.constant 0 : index
    %84 = vector.load %arg2[%c1_40, %c0_41, %c0_42] : memref<3x64x64xf32, #tpu.memory_space<vmem>>, vector<1x64x64xf32>
    %85 = vector.shape_cast %84 : vector<1x64x64xf32> to vector<64x64xf32>
    %cst_43 = arith.constant dense<0.000000e+00> : vector<32x64xf32>
    %86 = tpu.matmul %74, %85, %cst_43 {dimension_numbers = #tpu.dot_dimension_numbers<[1], [0], [0], [1], [0, 0, 1, 1], [], []>} : vector<32x64xf32>, vector<64x64xf32>, vector<32x64xf32> -> vector<32x64xf32>
    %87 = arith.addf %83, %86 : vector<32x64xf32>
    %c2_44 = arith.constant 2 : index
    %c0_45 = arith.constant 0 : index
    %c0_46 = arith.constant 0 : index
    %88 = vector.load %arg2[%c2_44, %c0_45, %c0_46] : memref<3x64x64xf32, #tpu.memory_space<vmem>>, vector<1x64x64xf32>
    %89 = vector.shape_cast %88 : vector<1x64x64xf32> to vector<64x64xf32>
    %cst_47 = arith.constant dense<0.000000e+00> : vector<32x64xf32>
    %90 = tpu.matmul %80, %89, %cst_47 {dimension_numbers = #tpu.dot_dimension_numbers<[1], [0], [0], [1], [0, 0, 1, 1], [], []>} : vector<32x64xf32>, vector<64x64xf32>, vector<32x64xf32> -> vector<32x64xf32>
    %91 = arith.addf %87, %90 : vector<32x64xf32>
    %cst_48 = arith.constant dense<0.000000e+00> : vector<64xf32>
    %92 = vector.multi_reduction <add>, %91, %cst_48 [0] : vector<32x64xf32> to vector<64xf32>
    %93 = vector.shape_cast %92 : vector<64xf32> to vector<1x64xf32>
    %94 = arith.mulf %91, %91 : vector<32x64xf32>
    %cst_49 = arith.constant dense<0.000000e+00> : vector<64xf32>
    %95 = vector.multi_reduction <add>, %94, %cst_49 [0] : vector<32x64xf32> to vector<64xf32>
    %96 = vector.shape_cast %95 : vector<64xf32> to vector<1x64xf32>
    %97 = tpu.concatenate %93, %96 in 0 : vector<1x64xf32>, vector<1x64xf32> -> vector<2x64xf32>
    %c0_50 = arith.constant 0 : index
    %c0_51 = arith.constant 0 : index
    %98 = vector.load %arg5[%c0_50, %c0_51] : memref<64x4xf32, #tpu.memory_space<vmem>>, vector<64x4xf32>
    %cst_52 = arith.constant dense<0.000000e+00> : vector<2x4xf32>
    %99 = tpu.matmul %97, %98, %cst_52 {dimension_numbers = #tpu.dot_dimension_numbers<[1], [0], [0], [1], [0, 0, 1, 1], [], []>, precision = #tpu.contract_precision<fp32>} : vector<2x64xf32>, vector<64x4xf32>, vector<2x4xf32> -> vector<2x4xf32>
    %c0_53 = arith.constant 0 : index
    %c0_54 = arith.constant 0 : index
    %100 = vector.load %arg6[%c0_53, %c0_54] : memref<4x64xf32, #tpu.memory_space<vmem>>, vector<4x64xf32>
    %cst_55 = arith.constant dense<0.000000e+00> : vector<2x64xf32>
    %101 = tpu.matmul %99, %100, %cst_55 {dimension_numbers = #tpu.dot_dimension_numbers<[1], [0], [0], [1], [0, 0, 1, 1], [], []>, precision = #tpu.contract_precision<fp32>} : vector<2x4xf32>, vector<4x64xf32>, vector<2x64xf32> -> vector<2x64xf32>
    %102 = vector.extract_strided_slice %101 {offsets = [0, 0], sizes = [1, 64], strides = [1, 1]} : vector<2x64xf32> to vector<1x64xf32>
    %103 = vector.extract_strided_slice %101 {offsets = [1, 0], sizes = [1, 64], strides = [1, 1]} : vector<2x64xf32> to vector<1x64xf32>
    %104 = arith.mulf %102, %102 : vector<1x64xf32>
    %105 = arith.subf %103, %104 : vector<1x64xf32>
    %cst_56 = arith.constant 0.000000e+00 : f32
    %106 = vector.broadcast %cst_56 : f32 to vector<1x64xf32>
    %107 = arith.maximumf %105, %106 : vector<1x64xf32>
    %cst_57 = arith.constant 9.99999974E-6 : f32
    %108 = vector.broadcast %cst_57 : f32 to vector<1x64xf32>
    %109 = arith.addf %107, %108 : vector<1x64xf32>
    %110 = math.rsqrt %109 : vector<1x64xf32>
    %111 = vector.broadcast %102 : vector<1x64xf32> to vector<32x64xf32>
    %112 = arith.subf %91, %111 : vector<32x64xf32>
    %c0_58 = arith.constant 0 : index
    %c0_59 = arith.constant 0 : index
    %113 = vector.load %arg9[%c0_58, %c0_59] : memref<1x64xf32, #tpu.memory_space<vmem>>, vector<1x64xf32>
    %114 = arith.mulf %110, %113 : vector<1x64xf32>
    %115 = vector.broadcast %114 : vector<1x64xf32> to vector<32x64xf32>
    %116 = arith.mulf %112, %115 : vector<32x64xf32>
    %c0_60 = arith.constant 0 : index
    %c0_61 = arith.constant 0 : index
    %117 = vector.load %arg10[%c0_60, %c0_61] : memref<1x64xf32, #tpu.memory_space<vmem>>, vector<1x64xf32>
    %118 = vector.broadcast %117 : vector<1x64xf32> to vector<32x64xf32>
    %119 = arith.addf %116, %118 : vector<32x64xf32>
    %120 = arith.addf %119, %0 : vector<32x64xf32>
    %c0_62 = arith.constant 0 : index
    %c0_63 = arith.constant 0 : index
    %121 = vector.load %arg11[%c0_62, %c0_63] : memref<32x64xf32, #tpu.memory_space<vmem>>, vector<32x64xf32>
    tpu.vector_store %arg11[%c0_62, %c0_63], %120 {strides = array<i32>} : memref<32x64xf32, #tpu.memory_space<vmem>>, vector<32x64xf32>,
    return
  }
}

</mosaic_0001>

<bundles_post_ra>
// kernel: resblock_pallas.1
= control target key start
LH: loop header
LB: loop body
LE: loop exit
PB: predicated region body
PF: predicated region fallthrough
CT: control target
= control target key end

     0   :  { %v42_v0 = vlaneseq  ;;  %vm146_vm2 = vcmask 523264   ;;  %vm3964_vm7 = vmmov 0   ;;  %vm473_vm8 = vcmask 1040384   ;;  %s3965_s21 = smov 64   ;;  %s5070_s1 = inlined_call_operand.vmem [shape: f32[3,64,128], index: 1, kind: input, shape index: {}]   ;;  %s5071_s0 = inlined_call_operand.vmem [shape: f32[32,64], index: 0, kind: input, shape index: {}]   ;;  %s5072_s3 = inlined_call_operand.vmem [shape: f32[128,8], index: 3, kind: input, shape index: {}]   ;;  %s5073_s4 = inlined_call_operand.vmem [shape: f32[8,128], index: 4, kind: input, shape index: {}]   ;;  %s5074_s2 = inlined_call_operand.vmem [shape: f32[3,64,64], index: 2, kind: input, shape index: {}]   ;;  %s5075_s7 = inlined_call_operand.vmem [shape: f32[1,128], index: 7, kind: input, shape index: {}]   ;;  %s5076_s8 = inlined_call_operand.vmem [shape: f32[1,128], index: 8, kind: input, shape index: {}]   ;;  %s5077_s5 = inlined_call_operand.vmem [shape: f32[64,4], index: 5, kind: input, shape index: {}]   ;;  %s5078_s6 = inlined_call_operand.vmem [shape: f32[4,64], index: 6, kind: input, shape index: {}]   ;;  %s5079_s9 = inlined_call_operand.vmem [shape: f32[1,64], index: 9, kind: input, shape index: {}]   ;;  %s5080_s10 = inlined_call_operand.vmem [shape: f32[1,64], index: 10, kind: input, shape index: {}]   ;;  %s5081_s11 = inlined_call_operand.vmem [shape: f32[32,64], index: 11, kind: output, shape index: {}]  }
   0x1   :  { %v3111_v1 = vld [vmem:[%s5070_s1 + $0x78] sm:$0xff]  ;;  %v3110_v3 = vld [vmem:[%s5070_s1 + $0x70] sm:$0xff]  ;;  %v3109_v5 = vld [vmem:[%s5070_s1 + $0x68] sm:$0xff]  ;;  %vm1133_vm9 = vcmask 64512   ;;  %vm2599_vm10 = vcmask 1043456   ;;  %vm2595_vm11 = vcmask 31744  }
   0x2   :  { %v136_v2 = vld [vmem:[%s5070_s1 + $0x38] sm:$0xff]  ;;  %3420 = vmatprep.subr.mxu0 %v3111_v1  ;;  %v135_v4 = vld [vmem:[%s5070_s1 + $0x30] sm:$0xff]  ;;  %v134_v6 = vld [vmem:[%s5070_s1 + $0x28] sm:$0xff]  ;;  %v4044_v7 = vshrl.u32 %v42_v0, 7 }
   0x3   :  { %3442 = vmatprep.subr.mxu1 %v136_v2  ;;  %3421 = vmatpush3.msra.mxu0 %v3111_v1  ;;  %v3108_v8 = vld [vmem:[%s5070_s1 + $0x60] sm:$0xff]  ;;  %v4060_v11 = vld [vmem:[%s5071_s0 + $0x18] sm:$0xff]  ;;  %v3106_v15 = vld [vmem:[%s5070_s1 + $0x50] sm:$0xff] }
   0x4   :  { %3443 = vmatpush3.msra.mxu1 %v136_v2  ;;  %3422 = vmatprep.subr.mxu0 %v3110_v3  ;;  %v133_v9 = vld [vmem:[%s5070_s1 + $0x20] sm:$0xff]  ;;  %v3107_v12 = vld [vmem:[%s5070_s1 + $0x58] sm:$0xff]  ;;  %v45_v14 = vadd.s32 16, %v4044_v7  ;;  %v51_v16 = vand.u32 15, %v4044_v7  ;;  %v106_v18 = vrot.slane %v4060_v11, 7  ;;  %v131_v19 = vld [vmem:[%s5070_s1 + $0x10] sm:$0xff] }
   0x5   :  { %3444 = vmatprep.subr.mxu1 %v135_v4  ;;  %3423 = vmatpush3.msra.mxu0 %v3110_v3  ;;  %v4055_v10 = vld [vmem:[%s5071_s0] sm:$0xff]  ;;  %v132_v13 = vld [vmem:[%s5070_s1 + $0x18] sm:$0xff]  ;;  %vm107_vm0 = vcmp.lt.s32.totalorder %v4044_v7, 1  ;;  %v4082_v20 = vld [vmem:[%s5071_s0 + $0x8] sm:$0xff]  ;;  %vm120_vm4 = vcmp.lt.s32.totalorder %v4044_v7, 7  ;;  %v44_v43 = vadd.s32 8, %v4044_v7 }
   0x6   :  { %3445 = vmatpush3.msra.mxu1 %v135_v4  ;;  %3424 = vmatprep.subr.mxu0 %v3109_v5  ;;  %v103_v17 = vrot.slane %v4055_v10, 7  ;;  %v4087_v21 = vld [vmem:[%s5071_s0 + $0x10] sm:$0xff]  ;;  %v3105_v22 = vld [vmem:[%s5070_s1 + $0x48] sm:$0xff]  ;;  %v65_v25 = vand.u32 15, %v45_v14  ;;  %vm4096_vm1 = vcmp.ne.s32.totalorder %v51_v16, 0  ;;  %v104_v28 = vrot.slane %v4082_v20, 7 }
   0x7   :  { %3446 = vmatprep.subr.mxu1 %v134_v6  ;;  %3425 = vmatpush3.msra.mxu0 %v3109_v5  ;;  %v130_v23 = vld [vmem:[%s5070_s1 + $0x8] sm:$0xff]  ;;  %v105_v24 = vrot.slane %v4087_v21, 7  ;;  %v3104_v29 = vld [vmem:[%s5070_s1 + $0x40] sm:$0xff]  ;;  %v3127_v35 = vld [vmem:[%s5070_s1 + $0xb8] sm:$0xff]  ;;  %v116_v36 = vrot.slane %v4055_v10, 1  ;;  %v117_v37 = vrot.slane %v4082_v20, 1 }
   0x8   :  { %3447 = vmatpush3.msra.mxu1 %v134_v6  ;;  %3426 = vmatprep.subr.mxu0 %v3108_v8  ;;  %v111_v27 = vsel %vm107_vm0, %v106_v18, %v103_v17  ;;  %v129_v30 = vld [vmem:[%s5070_s1] sm:$0xff]  ;;  %vm4111_vm3 = vcmp.ne.s32.totalorder %v65_v25, 0  ;;  %v110_v34 = vsel %vm107_vm0, %v103_v17, %v104_v28  ;;  %v3126_v39 = vld [vmem:[%s5070_s1 + $0xb0] sm:$0xff]  ;;  %v3125_v41 = vld [vmem:[%s5070_s1 + $0xa8] sm:$0xff]  ;;  %v118_v46 = vrot.slane %v4087_v21, 1 }
   0x9   :  { %3448 = vmatprep.subr.mxu1 %v133_v9  ;;  %3427 = vmatpush3.msra.mxu0 %v3108_v8  ;;  %v112_v31 = vsel %vm4096_vm1, %v111_v27, 0.0  ;;  %v109_v33 = vsel %vm107_vm0, %v104_v28, %v105_v24  ;;  %v108_v40 = vsel %vm107_vm0, %v105_v24, %v106_v18  ;;  %v123_v42 = vsel %vm120_vm4, %v116_v36, %v117_v37  ;;  %v3124_v44 = vld [vmem:[%s5070_s1 + $0xa0] sm:$0xff]  ;;  %v3123_v45 = vld [vmem:[%s5070_s1 + $0x98] sm:$0xff]  ;;  %v3122_v49 = vld [vmem:[%s5070_s1 + $0x90] sm:$0xff] }
   0xa   :  { %3449 = vmatpush3.msra.mxu1 %v133_v9  ;;  %3428 = vmatprep.subr.mxu0 %v3107_v12  ;;  %v114_v38 = vsel %vm4111_vm3, %v109_v33, 0.0  ;;  %v58_v47 = vand.u32 15, %v44_v43  ;;  %v46_v48 = vadd.s32 24, %v4044_v7  ;;  %v3121_v50 = vld [vmem:[%s5070_s1 + $0x88] sm:$0xff]  ;;  %v122_v52 = vsel %vm120_vm4, %v117_v37, %v118_v46  ;;  %v3120_v55 = vld [vmem:[%s5070_s1 + $0x80] sm:$0xff]  ;;  %v490_v61 = vld [vmem:[%s5072_s3 + $0x78] sm:$0xff] }
   0xb   :  { %3450 = vmatprep.subr.mxu1 %v132_v13  ;;  %3429 = vmatpush3.msra.mxu0 %v3107_v12  ;;  %v119_v53 = vrot.slane %v4060_v11, 1  ;;  %v4193_v62 = vand.u32 4294901760, %v490_v61  ;;  %v489_v63 = vld [vmem:[%s5072_s3 + $0x70] sm:$0xff]  ;;  %v488_v2 = vld [vmem:[%s5072_s3 + $0x68] sm:$0xff]  ;;  %v3963_v3 = vmov 0.0   ;;  %v487_v8 = vld [vmem:[%s5072_s3 + $0x60] sm:$0xff] }
   0xc   :  { %3451 = vmatpush3.msra.mxu1 %v132_v13  ;;  %3430 = vmatprep.subr.mxu0 %v3106_v15  ;;  %vm4165_vm5 = vcmp.ne.s32.totalorder %v58_v47, 15  ;;  %v72_v54 = vand.u32 15, %v46_v48  ;;  %v4201_v1 = vand.u32 4294901760, %v489_v63  ;;  %v4211_v6 = vand.u32 4294901760, %v488_v2  ;;  %v486_v13 = vld [vmem:[%s5072_s3 + $0x58] sm:$0xff]  ;;  %v484_v25 = vld [vmem:[%s5072_s3 + $0x48] sm:$0xff] }
   0xd   :  { %3452 = vmatprep.subr.mxu1 %v131_v19  ;;  %3431 = vmatpush3.msra.mxu0 %v3106_v15  ;;  %v126_v56 = vsel %vm4165_vm5, %v122_v52, 0.0  ;;  %v121_v57 = vsel %vm120_vm4, %v118_v46, %v119_v53  ;;  %v124_v59 = vsel %vm120_vm4, %v119_v53, %v116_v36  ;;  %v4199_v0 = vsub.f32 %v490_v61, %v4193_v62  ;;  %v483_v33 = vld [vmem:[%s5072_s3 + $0x40] sm:$0xff]  ;;  %v480_v52 = vld [vmem:[%s5072_s3 + $0x28] sm:$0xff]  ;;  %v2053_v51 = vld [vmem:[%s5077_s5 + $0x38] sm:$0xff] }
   0xe   :  { %3453 = vmatpush3.msra.mxu1 %v131_v19  ;;  %3432 = vmatprep.subr.mxu0 %v3105_v22  ;;  %vm4179_vm6 = vcmp.ne.s32.totalorder %v72_v54, 15  ;;  %v4209_v5 = vsub.f32 %v489_v63, %v4201_v1  ;;  %v4225_v12 = vand.u32 4294901760, %v487_v8  ;;  %v4240_v18 = vand.u32 4294901760, %v486_v13  ;;  %v485_v19 = vld [vmem:[%s5072_s3 + $0x50] sm:$0xff] }
   0xf   :  { %3454 = vmatprep.subr.mxu1 %v130_v23  ;;  %3433 = vmatpush3.msra.mxu0 %v3105_v22  ;;  %v128_v60 = vsel %vm4179_vm6, %v124_v59, 0.0  ;;  %v585_v4 = vand.u32 4294901760, %v4199_v0  ;;  %v4280_v37 = vand.u32 4294901760, %v483_v33  ;;  %v479_v59 = vld [vmem:[%s5072_s3 + $0x20] sm:$0xff] }
  0x10   :  { %3455 = vmatpush3.msra.mxu1 %v130_v23  ;;  %3434 = vmatprep.subr.mxu0 %v3104_v29  ;;  %v4237_v17 = vsub.f32 %v487_v8, %v4225_v12  ;;  %v4250_v23 = vand.u32 4294901760, %v485_v19  ;;  %v4255_v24 = vsub.f32 %v486_v13, %v4240_v18 }
  0x11   :  { %3456 = vmatprep.subr.mxu1 %v129_v30  ;;  %3435 = vmatpush3.msra.mxu0 %v3104_v29  ;;  %v586_v9 = vsub.f32 %v4199_v0, %v585_v4 }
  0x12   :  { %3436 = vmatprep.mubr.msk.f32.mxu0 %vm146_vm2, %v4055_v10  ;;  %3457 = vmatpush3.msra.mxu1 %v129_v30  ;;  %v5096_v10 = vand.u32 4294901760, %v4209_v5  ;;  %v5094_v22 = vand.u32 4294901760, %v4237_v17  ;;  %v4265_v29 = vsub.f32 %v485_v19, %v4250_v23  ;;  %v4267_v30 = vand.u32 4294901760, %v484_v25 }
  0x13   :  { %3458 = vmatprep.mubr.msk.f32.mxu1 %vm146_vm2, %v112_v31  ;;  %3437 = vmatmul.mubr.msk.f32.vlgmr.msra.gmra.mxu0 %vm146_vm2, %v4082_v20  ;;  %v587_v14 = vand.u32 4294901760, %v586_v9  ;;  %v5093_v31 = vand.u32 4294901760, %v4255_v24  ;;  %v478_v9 = vld [vmem:[%s5072_s3 + $0x18] sm:$0xff] }
  0x14   :  { %3459 = vmatmul.mubr.msk.f32.vlgmr.msra.gmra.mxu1 %vm146_vm2, %v110_v34  ;;  %3464 = vmatprep.subr.mxu0 %v3127_v35  ;;  %v593_v15 = vsub.f32 %v4209_v5, %v5096_v10  ;;  %v607_v28 = vsub.f32 %v4237_v17, %v5094_v22  ;;  %v4278_v36 = vsub.f32 %v484_v25, %v4267_v30  ;;  %v4355_v19 = vand.u32 4294901760, %v478_v9 }
  0x15   :  { %3439 = vmatprep.mubr.msk.f32.mxu0 %vm146_vm2, %v4087_v21  ;;  %3465 = vmatpush3.msra.mxu0 %v3127_v35  ;;  %v5092_v35 = vand.u32 4294901760, %v4265_v29 }
  0x16   :  { %3461 = vmatprep.mubr.msk.f32.mxu1 %vm146_vm2, %v114_v38  ;;  %3466 = vmatprep.subr.mxu0 %v3126_v39  ;;  %v594_v20 = vand.u32 4294901760, %v593_v15  ;;  %v608_v34 = vand.u32 4294901760, %v607_v28  ;;  %v614_v38 = vsub.f32 %v4255_v24, %v5093_v31  ;;  %v4371_v28 = vsub.f32 %v478_v9, %v4355_v19 }
  0x17   :  { %3467 = vmatpush3.msra.mxu0 %v3126_v39  ;;  %3486 = vmatprep.subr.mxu1 %v3963_v3  ;;  %v482_v39 = vld [vmem:[%s5072_s3 + $0x38] sm:$0xff] }
  0x18   :  { %3462 = vmatmul.mubr.msk.f32.gmra.mxu1 %vm146_vm2, %v108_v40  ;;  %3468 = vmatprep.subr.mxu0 %v3125_v41  ;;  %v621_v40 = vsub.f32 %v4265_v29, %v5092_v35  ;;  %v4298_v43 = vand.u32 4294901760, %v482_v39 }
  0x19   :  { %3440 = vmatmul.mubr.msk.f32.gmra.mxu0 %vm146_vm2, %v4060_v11  ;;  %3487 = vmatpush3.msra.mxu1 %v4193_v62  ;;  %v4223_v11 = vsub.f32 %v488_v2, %v4211_v6  ;;  %v4342_v2 = vand.u32 4294901760, %v479_v59 }
  0x1a   :  { %3469 = vmatpush3.msra.mxu0 %v3125_v41  ;;  %3480 = vmatprep.mubr.msk.f32.mxu0 %vm146_vm2, %v123_v42  ;;  %v5091_v41 = vand.u32 4294901760, %v4278_v36  ;;  %v4296_v42 = vsub.f32 %v483_v33, %v4280_v37  ;;  %v622_v46 = vand.u32 4294901760, %v621_v40 }
  0x1b   :  { %3470 = vmatprep.subr.mxu0 %v3124_v44  ;;  %3488 = vmatprep.subr.mxu1 %v3963_v3  ;;  %v5095_v16 = vand.u32 4294901760, %v4223_v11  ;;  %v4353_v15 = vsub.f32 %v479_v59, %v4342_v2 }
  0x1c   :  { %3471 = vmatpush3.msra.mxu0 %v3124_v44  ;;  %3489 = vmatpush3.msra.mxu1 %v4201_v1  ;;  %v615_v44 = vand.u32 4294901760, %v614_v38  ;;  %v628_v47 = vsub.f32 %v4278_v36, %v5091_v41  ;;  %v5090_v48 = vand.u32 4294901760, %v4296_v42  ;;  %v476_v38 = vld [vmem:[%s5072_s3 + $0x8] sm:$0xff] }
  0x1d   :  { %3472 = vmatprep.subr.mxu0 %v3123_v45  ;;  %3490 = vmatprep.subr.mxu1 %v3963_v3  ;;  %v600_v21 = vsub.f32 %v4223_v11, %v5095_v16 }
  0x1e   :  { %3473 = vmatpush3.msra.mxu0 %v3123_v45  ;;  %3491 = vmatpush3.msra.mxu1 %v4211_v6  ;;  %v481_v45 = vld [vmem:[%s5072_s3 + $0x30] sm:$0xff]  ;;  %v629_v53 = vand.u32 4294901760, %v628_v47  ;;  %v635_v54 = vsub.f32 %v4296_v42, %v5090_v48  ;;  %v475_v47 = vld [vmem:[%s5072_s3] sm:$0xff] }
  0x1f   :  { %3474 = vmatprep.subr.mxu0 %v3122_v49  ;;  %3492 = vmatprep.subr.mxu1 %v3963_v3  ;;  %v601_v27 = vand.u32 4294901760, %v600_v21  ;;  %v477_v21 = vld [vmem:[%s5072_s3 + $0x10] sm:$0xff]  ;;  %v4400_v59 = vand.u32 4294901760, %v475_v47 }
  0x20   :  { %3475 = vmatpush3.msra.mxu0 %v3122_v49  ;;  %3493 = vmatpush3.msra.mxu1 %v4225_v12  ;;  %v4311_v49 = vsub.f32 %v482_v39, %v4298_v43  ;;  %v4373_v33 = vand.u32 4294901760, %v477_v21 }
  0x21   :  { %3476 = vmatprep.subr.mxu0 %v3121_v50  ;;  %3494 = vmatprep.subr.mxu1 %v3963_v3 }
  0x22   :  { %3477 = vmatpush3.msra.mxu0 %v3121_v50  ;;  %3495 = vmatpush3.msra.mxu1 %v4240_v18  ;;  %v4314_v50 = vand.u32 4294901760, %v481_v45 }
  0x23   :  { %3478 = vmatprep.subr.mxu0 %v3120_v55  ;;  %3496 = vmatprep.subr.mxu1 %v3963_v3 }
  0x24   :  { %3479 = vmatpush3.msra.mxu0 %v3120_v55  ;;  %3497 = vmatpush3.msra.mxu1 %v4250_v23  ;;  %v5089_v55 = vand.u32 4294901760, %v4311_v49 }
  0x25   :  { %3481 = vmatmul.mubr.msk.f32.vlgmr.msra.gmra.mxu0 %vm146_vm2, %v126_v56  ;;  %3521 = vmatprep.subr.mxu0 %v3963_v3  ;;  %v4325_v56 = vand.u32 4294901760, %v480_v52 }
  0x26   :  { %3483 = vmatprep.mubr.msk.f32.mxu0 %vm146_vm2, %v121_v57  ;;  %3522 = vmatpush3.msra.mxu0 %v587_v14  ;;  %v4329_v57 = vsub.f32 %v481_v45, %v4314_v50  ;;  %v642_v61 = vsub.f32 %v4311_v49, %v5089_v55  ;;  %v4386_v45 = vsub.f32 %v477_v21, %v4373_v33 }
  0x27   :  { %3523 = vmatprep.subr.mxu0 %v3963_v3  ;;  %3498 = vmatprep.subr.mxu1 %v3963_v3  ;;  %v4340_v63 = vsub.f32 %v480_v52, %v4325_v56 }
  0x28   :  { %3524 = vmatpush3.msra.mxu0 %v594_v20  ;;  %3499 = vmatpush3.msra.mxu1 %v4267_v30  ;;  %v5088_v8 = vand.u32 4294901760, %v4329_v57  ;;  %v643_v13 = vand.u32 4294901760, %v642_v61 }
  0x29   :  { %3484 = vmatmul.mubr.msk.f32.gmra.mxu0 %vm146_vm2, %v128_v60  ;;  %3525 = vmatprep.subr.mxu0 %v3963_v3  ;;  %v636_v60 = vand.u32 4294901760, %v635_v54  ;;  %v5087_v14 = vand.u32 4294901760, %v4340_v63  ;;  %v5084_v54 = vand.u32 4294901760, %v4386_v45 }
  0x2a   :  { %3526 = vmatpush3.msra.mxu0 %v601_v27  ;;  %3500 = vmatprep.subr.mxu1 %v3963_v3  ;;  %v649_v20 = vsub.f32 %v4329_v57, %v5088_v8  ;;  %v5086_v27 = vand.u32 4294901760, %v4353_v15 }
  0x2b   :  { %3527 = vmatprep.subr.mxu0 %v3963_v3  ;;  %3501 = vmatpush3.msra.mxu1 %v4280_v37  ;;  %v656_v25 = vsub.f32 %v4340_v63, %v5087_v14  ;;  %v677_v9 = vsub.f32 %v4386_v45, %v5084_v54 }
  0x2c   :  { %3528 = vmatpush3.msra.mxu0 %v608_v34  ;;  %3502 = vmatprep.subr.mxu1 %v3963_v3  ;;  %v650_v34 = vand.u32 4294901760, %v649_v20  ;;  %v663_v40 = vsub.f32 %v4353_v15, %v5086_v27 }
  0x2d   :  { %3529 = vmatprep.subr.mxu0 %v3963_v3  ;;  %3503 = vmatpush3.msra.mxu1 %v4298_v43  ;;  %v657_v39 = vand.u32 4294901760, %v656_v25  ;;  %v678_v21 = vand.u32 4294901760, %v677_v9 }
  0x2e   :  { %3530 = vmatpush3.msra.mxu0 %v615_v44  ;;  %3504 = vmatprep.subr.mxu1 %v3963_v3  ;;  %v5085_v44 = vand.u32 4294901760, %v4371_v28  ;;  %v664_v52 = vand.u32 4294901760, %v663_v40 }
  0x2f   :  { %3531 = vmatprep.subr.mxu0 %v3963_v3  ;;  %3505 = vmatpush3.msra.mxu1 %v4314_v50 }
  0x30   :  { %3532 = vmatpush3.msra.mxu0 %v622_v46  ;;  %3506 = vmatprep.subr.mxu1 %v3963_v3  ;;  %v4389_v46 = vand.u32 4294901760, %v476_v38 }
  0x31   :  { %3533 = vmatprep.subr.mxu0 %v3963_v3  ;;  %3507 = vmatpush3.msra.mxu1 %v4325_v56 }
  0x32   :  { %3534 = vmatpush3.msra.mxu0 %v629_v53  ;;  %3508 = vmatprep.subr.mxu1 %v3963_v3  ;;  %v670_v53 = vsub.f32 %v4371_v28, %v5085_v44 }
  0x33   :  { %3535 = vmatprep.subr.mxu0 %v3963_v3  ;;  %3509 = vmatpush3.msra.mxu1 %v4342_v2 }
  0x34   :  { %3536 = vmatpush3.msra.mxu0 %v636_v60  ;;  %3510 = vmatprep.subr.mxu1 %v3963_v3  ;;  %v4404_v60 = vsub.f32 %v476_v38, %v4389_v46  ;;  %v671_v61 = vand.u32 4294901760, %v670_v53 }
  0x35   :  { %3537 = vmatprep.subr.mxu0 %v3963_v3  ;;  %3511 = vmatpush3.msra.mxu1 %v4355_v19 }
  0x36   :  { %3538 = vmatpush3.msra.mxu0 %v643_v13  ;;  %3512 = vmatprep.subr.mxu1 %v3963_v3  ;;  %v4412_v13 = vsub.f32 %v475_v47, %v4400_v59  ;;  %v5083_v20 = vand.u32 4294901760, %v4404_v60 }
  0x37   :  { %3539 = vmatprep.subr.mxu0 %v3963_v3  ;;  %3513 = vmatpush3.msra.mxu1 %v4373_v33 }
  0x38   :  { %3540 = vmatpush3.msra.mxu0 %v650_v34  ;;  %3514 = vmatprep.subr.mxu1 %v3963_v3  ;;  %v5082_v25 = vand.u32 4294901760, %v4412_v13  ;;  %v684_v34 = vsub.f32 %v4404_v60, %v5083_v20 }
  0x39   :  { %3541 = vmatprep.subr.mxu0 %v3963_v3  ;;  %3515 = vmatpush3.msra.mxu1 %v4389_v46 }
  0x3a   :  { %3542 = vmatpush3.msra.mxu0 %v657_v39  ;;  %3516 = vmatprep.subr.mxu1 %v3963_v3  ;;  %v691_v38 = vsub.f32 %v4412_v13, %v5082_v25  ;;  %v685_v39 = vand.u32 4294901760, %v684_v34 }
  0x3b   :  { %3543 = vmatprep.subr.mxu0 %v3963_v3  ;;  %3517 = vmatpush3.msra.mxu1 %v4400_v59 }
  0x3c   :  { %3544 = vmatpush3.msra.mxu0 %v664_v52  ;;  %3556 = vmatprep.subr.mxu1 %v3963_v3  ;;  %v692_v40 = vand.u32 4294901760, %v691_v38 }
  0x3d   :  { %3545 = vmatprep.subr.mxu0 %v3963_v3  ;;  %3553 = vmatprep.mubr.msk.f32.mxu0 %vm3964_vm7, %v3963_v3 }
  0x3e   :  { %3546 = vmatpush3.msra.mxu0 %v671_v61  ;;  %3518 = vmatprep.mubr.msk.f32.mxu1 %vm3964_vm7, %v3963_v3 }
  0x3f   :  { %3547 = vmatprep.subr.mxu0 %v3963_v3 }
  0x40   :  { %3548 = vmatpush3.msra.mxu0 %v678_v21 }
  0x41   :  { %3549 = vmatprep.subr.mxu0 %v3963_v3 }
  0x42   :  { %3550 = vmatpush3.msra.mxu0 %v685_v39 }
  0x43   :  { %3551 = vmatprep.subr.mxu0 %v3963_v3 }
  0x44   :  { %3552 = vmatpush3.msra.mxu0 %v692_v40 }
  0x45   :  { %3591 = vmatprep.subr.mxu0 %v3963_v3 }
  0xd3   :  { %v3438_v47 = vpop.f32.mrf.mxu0 }
  0xd4   :  { %v3460_v52 = vpop.f32.mrf.mxu1 }
  0xd5   :  { %v225_v53 = vpop.f32.mrf.mxu0  ;;  %v328_v25 = vadd.f32 %v3460_v52, %v3438_v47 }
  0xd6   :  { %v322_v9 = vpop.f32.mrf.mxu1 }
  0xd7   :  { %v323_v20 = vadd.f32 %v322_v9, %v225_v53 }
  0xd8   :  { %v3463_v21 = vpop.f32.mrf.mxu1 }
  0xd9   :  { %v3441_v61 = vpop.f32.mrf.mxu0 }
  0xda   :  { %v332_v54 = vpop.f32.mrf.mxu1  ;;  %v338_v40 = vadd.f32 %v3463_v21, %v3441_v61 }
  0xdb   :  { %v235_v34 = vpop.f32.mrf.mxu0 }
  0xdc   :  { %v333_v8 = vadd.f32 %v332_v54, %v235_v34 }
  0xe5   :  { %v3482_v38 = vpop.f32.mrf.mxu0 }
  0xe6   :  { %v4436_v44 = vadd.f32 %v3482_v38, %v328_v25 }
  0xe7   :  { %v428_v39 = vpop.f32.mrf.mxu0 }
  0xe8   :  { %v4438_v27 = vadd.f32 %v428_v39, %v323_v20  ;;  %v461_v41 = vmul.f32 %v4436_v44, %v4436_v44 }
  0xe9   :  { %v3485_v14 = vpop.f32.mrf.mxu0 }
  0xea   :  { %v460_v55 = vmul.f32 %v4438_v27, %v4438_v27  ;;  %v451_v47 = vadd.f32 %v4436_v44, %v4438_v27  ;;  %v4446_v52 = vadd.f32 %v3485_v14, %v338_v40 }
  0xeb   :  { %v438_v48 = vpop.f32.mrf.mxu0 }
  0xec   :  { %v4448_v53 = vadd.f32 %v438_v48, %v333_v8  ;;  %v464_v25 = vadd.f32 %v461_v41, %v460_v55  ;;  %v463_v61 = vmul.f32 %v4446_v52, %v4446_v52 }
  0xee   :  { %v452_v20 = vadd.f32 %v451_v47, %v4448_v53  ;;  %v462_v54 = vmul.f32 %v4448_v53, %v4448_v53 }
  0xf0   :  { %v453_v9 = vadd.f32 %v452_v20, %v4446_v52  ;;  %v465_v21 = vadd.f32 %v464_v25, %v462_v54 }
  0xf2   :  { %v454_v34 = vrot.slane %v453_v9, 4  ;;  %v466_v38 = vadd.f32 %v465_v21, %v463_v61 }
  0xf4   :  { %v455_v39 = vadd.f32 %v454_v34, %v453_v9  ;;  %v467_v35 = vrot.slane %v466_v38, 4 }
  0xf6   :  { %v456_v14 = vrot.slane %v455_v39, 2  ;;  %v468_v40 = vadd.f32 %v467_v35, %v466_v38 }
  0xf8   :  { %v457_v48 = vadd.f32 %v456_v14, %v455_v39  ;;  %v469_v8 = vrot.slane %v468_v40, 2 }
  0xfa   :  { %v458_v41 = vrot.slane %v457_v48, 1  ;;  %v470_v55 = vadd.f32 %v469_v8, %v468_v40  ;;  %v3145_v40 = vld [vmem:[%s5074_s2 + $0x78] sm:$0xff] }
  0xfb   :  { %v1701_v8 = vld [vmem:[%s5074_s2 + $0x38] sm:$0xff] }
  0xfc   :  { %v471_v47 = vrot.slane %v470_v55, 1  ;;  %v459_v31 = vadd.f32 %v458_v41, %v457_v48  ;;  %v3144_v48 = vld [vmem:[%s5074_s2 + $0x70] sm:$0xff] }
  0xfd   :  { %v1700_v41 = vld [vmem:[%s5074_s2 + $0x30] sm:$0xff] }
  0xfe   :  { %v472_v22 = vadd.f32 %v471_v47, %v470_v55  ;;  %v3143_v55 = vld [vmem:[%s5074_s2 + $0x68] sm:$0xff] }
  0xff   :  { %v1699_v47 = vld [vmem:[%s5074_s2 + $0x28] sm:$0xff] }
 0x100   :  { %v474_v16 = vsel %vm473_vm8, %v459_v31, %v472_v22  ;;  %v5119_v31 = vand.u32 4294901760, %v4412_v13 }
 0x101   :  { %v4457_v10 = vand.u32 4294901760, %v474_v16 }
 0x103   :  { %v4460_v25 = vsub.f32 %v474_v16, %v4457_v10  ;;  %3554 = vmatmul.mubr.f32.vlgmr.msra.gmra.mxu0 %v4457_v10 }
 0x104   :  { %3592 = vmatpush3.msra.mxu0 %v4193_v62  ;;  %3623 = vmatprep.mubr.msk.f32.mxu0 %vm3964_vm7, %v3963_v3 }
 0x105   :  { %3593 = vmatprep.subr.mxu0 %v3963_v3  ;;  %v574_v35 = vand.u32 4294901760, %v4460_v25 }
 0x106   :  { %3594 = vmatpush3.msra.mxu0 %v4201_v1 }
 0x107   :  { %3595 = vmatprep.subr.mxu0 %v3963_v3  ;;  %v575_v22 = vsub.f32 %v4460_v25, %v574_v35 }
 0x108   :  { %3596 = vmatpush3.msra.mxu0 %v4211_v6 }
 0x109   :  { %3597 = vmatprep.subr.mxu0 %v3963_v3  ;;  %v576_v16 = vand.u32 4294901760, %v575_v22  ;;  %v3141_v22 = vld [vmem:[%s5074_s2 + $0x58] sm:$0xff] }
 0x10a   :  { %3598 = vmatpush3.msra.mxu0 %v4225_v12 }
 0x10b   :  { %3599 = vmatprep.subr.mxu0 %v3963_v3  ;;  %3519 = vmatmul.mubr.f32.vlgmr.msra.gmra.mxu1 %v576_v16  ;;  %v3140_v16 = vld [vmem:[%s5074_s2 + $0x50] sm:$0xff] }
 0x10c   :  { %3557 = vmatpush3.msra.mxu1 %v4199_v0  ;;  %3600 = vmatpush3.msra.mxu0 %v4240_v18  ;;  %v5107_v0 = vand.u32 4294901760, %v4237_v17 }
 0x10d   :  { %3558 = vmatprep.subr.mxu1 %v3963_v3  ;;  %3601 = vmatprep.subr.mxu0 %v3963_v3 }
 0x10e   :  { %3559 = vmatpush3.msra.mxu1 %v4209_v5  ;;  %3602 = vmatpush3.msra.mxu0 %v4250_v23 }
 0x10f   :  { %3560 = vmatprep.subr.mxu1 %v3963_v3  ;;  %3603 = vmatprep.subr.mxu0 %v3963_v3 }
 0x110   :  { %3561 = vmatpush3.msra.mxu1 %v4223_v11  ;;  %3604 = vmatpush3.msra.mxu0 %v4267_v30 }
 0x111   :  { %3562 = vmatprep.subr.mxu1 %v3963_v3  ;;  %3605 = vmatprep.subr.mxu0 %v3963_v3 }
 0x112   :  { %3563 = vmatpush3.msra.mxu1 %v4237_v17  ;;  %3606 = vmatpush3.msra.mxu0 %v4280_v37  ;;  %v5113_v17 = vand.u32 4294901760, %v4329_v57 }
 0x113   :  { %3564 = vmatprep.subr.mxu1 %v3963_v3  ;;  %3607 = vmatprep.subr.mxu0 %v3963_v3 }
 0x114   :  { %3565 = vmatpush3.msra.mxu1 %v4255_v24  ;;  %3608 = vmatpush3.msra.mxu0 %v4298_v43 }
 0x115   :  { %3566 = vmatprep.subr.mxu1 %v3963_v3  ;;  %3609 = vmatprep.subr.mxu0 %v3963_v3 }
 0x116   :  { %3567 = vmatpush3.msra.mxu1 %v4265_v29  ;;  %3610 = vmatpush3.msra.mxu0 %v4314_v50 }
 0x117   :  { %3568 = vmatprep.subr.mxu1 %v3963_v3  ;;  %3611 = vmatprep.subr.mxu0 %v3963_v3 }
 0x118   :  { %3569 = vmatpush3.msra.mxu1 %v4278_v36  ;;  %3612 = vmatpush3.msra.mxu0 %v4325_v56 }
 0x119   :  { %3570 = vmatprep.subr.mxu1 %v3963_v3  ;;  %3613 = vmatprep.subr.mxu0 %v3963_v3 }
 0x11a   :  { %3571 = vmatpush3.msra.mxu1 %v4296_v42  ;;  %3614 = vmatpush3.msra.mxu0 %v4342_v2 }
 0x11b   :  { %3572 = vmatprep.subr.mxu1 %v3963_v3  ;;  %3615 = vmatprep.subr.mxu0 %v3963_v3 }
 0x11c   :  { %3573 = vmatpush3.msra.mxu1 %v4311_v49  ;;  %3616 = vmatpush3.msra.mxu0 %v4355_v19 }
 0x11d   :  { %3574 = vmatprep.subr.mxu1 %v3963_v3  ;;  %3617 = vmatprep.subr.mxu0 %v3963_v3 }
 0x11e   :  { %3575 = vmatpush3.msra.mxu1 %v4329_v57  ;;  %3618 = vmatpush3.msra.mxu0 %v4373_v33 }
 0x11f   :  { %3576 = vmatprep.subr.mxu1 %v3963_v3  ;;  %3619 = vmatprep.subr.mxu0 %v3963_v3 }
 0x120   :  { %3577 = vmatpush3.msra.mxu1 %v4340_v63  ;;  %3620 = vmatpush3.msra.mxu0 %v4389_v46 }
 0x121   :  { %3578 = vmatprep.subr.mxu1 %v3963_v3  ;;  %3621 = vmatprep.subr.mxu0 %v3963_v3 }
 0x122   :  { %3579 = vmatpush3.msra.mxu1 %v4353_v15  ;;  %3622 = vmatpush3.msra.mxu0 %v4400_v59 }
 0x123   :  { %3580 = vmatprep.subr.mxu1 %v3963_v3  ;;  %3624 = vmatmul.mubr.f32.vlgmr.msra.gmra.mxu0 %v574_v35  ;;  %v1698_v35 = vld [vmem:[%s5074_s2 + $0x20] sm:$0xff] }
 0x124   :  { %3661 = vmatprep.subr.mxu0 %v3963_v3  ;;  %3581 = vmatpush3.msra.mxu1 %v4371_v28 }
 0x125   :  { %3662 = vmatpush3.msra.mxu0 %v4193_v62  ;;  %3582 = vmatprep.subr.mxu1 %v3963_v3  ;;  %v5105_v62 = vand.u32 4294901760, %v4209_v5  ;;  %v5109_v5 = vand.u32 4294901760, %v4265_v29  ;;  %v5117_v29 = vand.u32 4294901760, %v4386_v45 }
 0x126   :  { %3663 = vmatprep.subr.mxu0 %v3963_v3  ;;  %3583 = vmatpush3.msra.mxu1 %v4386_v45 }
 0x127   :  { %3664 = vmatpush3.msra.mxu0 %v4201_v1  ;;  %3584 = vmatprep.subr.mxu1 %v3963_v3  ;;  %v5106_v1 = vand.u32 4294901760, %v4223_v11  ;;  %v5111_v11 = vand.u32 4294901760, %v4296_v42 }
 0x128   :  { %3665 = vmatprep.subr.mxu0 %v3963_v3  ;;  %3585 = vmatpush3.msra.mxu1 %v4404_v60 }
 0x129   :  { %3666 = vmatpush3.msra.mxu0 %v4211_v6  ;;  %3586 = vmatprep.subr.mxu1 %v3963_v3  ;;  %v5110_v6 = vand.u32 4294901760, %v4278_v36  ;;  %v1132_v36 = vld [vmem:[%s5073_s4] sm:$0xff] }
 0x12a   :  { %3667 = vmatprep.subr.mxu0 %v3963_v3  ;;  %3587 = vmatpush3.msra.mxu1 %v4412_v13 }
 0x12b   :  { %3588 = vmatprep.mubr.msk.f32.mxu1 %vm3964_vm7, %v3963_v3  ;;  %3668 = vmatpush3.msra.mxu0 %v4225_v12  ;;  %v5112_v12 = vand.u32 4294901760, %v4311_v49 }
 0x12c   :  { %3589 = vmatmul.mubr.f32.vlgmr.msra.gmra.mxu1 %v4460_v25  ;;  %3626 = vmatprep.subr.mxu1 %v3963_v3  ;;  %v3142_v25 = vld [vmem:[%s5074_s2 + $0x60] sm:$0xff] }
 0x12d   :  { %3669 = vmatprep.subr.mxu0 %v3963_v3  ;;  %3627 = vmatpush3.msra.mxu1 %v585_v4  ;;  %v5108_v4 = vand.u32 4294901760, %v4255_v24  ;;  %v5116_v24 = vand.u32 4294901760, %v4371_v28 }
 0x12e   :  { %3670 = vmatpush3.msra.mxu0 %v4240_v18  ;;  %3628 = vmatprep.subr.mxu1 %v3963_v3  ;;  %v5114_v18 = vand.u32 4294901760, %v4340_v63 }
 0x12f   :  { %3671 = vmatprep.subr.mxu0 %v3963_v3  ;;  %3629 = vmatpush3.msra.mxu1 %v5105_v62 }
 0x130   :  { %3672 = vmatpush3.msra.mxu0 %v4250_v23  ;;  %3630 = vmatprep.subr.mxu1 %v3963_v3  ;;  %v5115_v23 = vand.u32 4294901760, %v4353_v15 }
 0x131   :  { %3673 = vmatprep.subr.mxu0 %v3963_v3  ;;  %3631 = vmatpush3.msra.mxu1 %v5106_v1 }
 0x132   :  { %3674 = vmatpush3.msra.mxu0 %v4267_v30  ;;  %3632 = vmatprep.subr.mxu1 %v3963_v3  ;;  %v5118_v30 = vand.u32 4294901760, %v4404_v60 }
 0x133   :  { %3675 = vmatprep.subr.mxu0 %v3963_v3  ;;  %3633 = vmatpush3.msra.mxu1 %v5107_v0 }
 0x134   :  { %3676 = vmatpush3.msra.mxu0 %v4280_v37  ;;  %3634 = vmatprep.subr.mxu1 %v3963_v3  ;;  %v1168_v37 = vand.u32 4294901760, %v1132_v36 }
 0x135   :  { %3677 = vmatprep.subr.mxu0 %v3963_v3  ;;  %3635 = vmatpush3.msra.mxu1 %v5108_v4 }
 0x136   :  { %3678 = vmatpush3.msra.mxu0 %v4298_v43  ;;  %3636 = vmatprep.subr.mxu1 %v3963_v3  ;;  %v1245_v42 = vsub.f32 %v1132_v36, %v1168_v37 }
 0x137   :  { %3679 = vmatprep.subr.mxu0 %v3963_v3  ;;  %3637 = vmatpush3.msra.mxu1 %v5109_v5 }
 0x138   :  { %3680 = vmatpush3.msra.mxu0 %v4314_v50  ;;  %3638 = vmatprep.subr.mxu1 %v3963_v3  ;;  %v1246_v43 = vand.u32 4294901760, %v1245_v42 }
 0x139   :  { %3681 = vmatprep.subr.mxu0 %v3963_v3  ;;  %3639 = vmatpush3.msra.mxu1 %v5110_v6 }
 0x13a   :  { %3682 = vmatpush3.msra.mxu0 %v4325_v56  ;;  %3640 = vmatprep.subr.mxu1 %v3963_v3  ;;  %v1247_v21 = vsub.f32 %v1245_v42, %v1246_v43 }
 0x13b   :  { %3683 = vmatprep.subr.mxu0 %v3963_v3  ;;  %3641 = vmatpush3.msra.mxu1 %v5111_v11 }
 0x13c   :  { %3684 = vmatpush3.msra.mxu0 %v4342_v2  ;;  %3642 = vmatprep.subr.mxu1 %v3963_v3  ;;  %v1248_v39 = vand.u32 4294901760, %v1247_v21 }
 0x13d   :  { %3685 = vmatprep.subr.mxu0 %v3963_v3  ;;  %3643 = vmatpush3.msra.mxu1 %v5112_v12 }
 0x13e   :  { %3686 = vmatpush3.msra.mxu0 %v4355_v19  ;;  %3644 = vmatprep.subr.mxu1 %v3963_v3 }
 0x13f   :  { %3687 = vmatprep.subr.mxu0 %v3963_v3  ;;  %3645 = vmatpush3.msra.mxu1 %v5113_v17 }
 0x140   :  { %3688 = vmatpush3.msra.mxu0 %v4373_v33  ;;  %3646 = vmatprep.subr.mxu1 %v3963_v3 }
 0x141   :  { %3689 = vmatprep.subr.mxu0 %v3963_v3  ;;  %3647 = vmatpush3.msra.mxu1 %v5114_v18 }
 0x142   :  { %3690 = vmatpush3.msra.mxu0 %v4389_v46  ;;  %3648 = vmatprep.subr.mxu1 %v3963_v3 }
 0x143   :  { %3691 = vmatprep.subr.mxu0 %v3963_v3  ;;  %3649 = vmatpush3.msra.mxu1 %v5115_v23 }
 0x144   :  { %3692 = vmatpush3.msra.mxu0 %v4400_v59  ;;  %3693 = vmatprep.mubr.msk.f32.mxu0 %vm3964_vm7, %v3963_v3 }
 0x145   :  { %3650 = vmatprep.subr.mxu1 %v3963_v3  ;;  %3694 = vmatmul.mubr.f32.vlgmr.msra.gmra.mxu0 %v4457_v10 }
 0x146   :  { %3651 = vmatpush3.msra.mxu1 %v5116_v24  ;;  %3658 = vmatprep.mubr.msk.f32.mxu1 %vm3964_vm7, %v3963_v3 }
 0x147   :  { %3652 = vmatprep.subr.mxu1 %v3963_v3  ;;  %3716 = vmatprep.subr.mxu0 %v3963_v3 }
 0x148   :  { %3653 = vmatpush3.msra.mxu1 %v5117_v29  ;;  %3718 = vmatprep.mubr.msk.f32.mxu0 %vm3964_vm7, %v3963_v3 }
 0x149   :  { %3654 = vmatprep.subr.mxu1 %v3963_v3  ;;  %3717 = vmatpush3.msra.mxu0 %v1246_v43 }
 0x14a   :  { %3655 = vmatpush3.msra.mxu1 %v5118_v30  ;;  %3726 = vmatprep.subr.mxu0 %v3145_v40 }
 0x14b   :  { %3656 = vmatprep.subr.mxu1 %v3963_v3 }
 0x14c   :  { %3657 = vmatpush3.msra.mxu1 %v5119_v31 }
 0x14d   :  { %3659 = vmatmul.mubr.f32.vlgmr.msra.gmra.mxu1 %v4457_v10  ;;  %3696 = vmatprep.subr.mxu1 %v3963_v3 }
 0x14e   :  { %3698 = vmatprep.mubr.msk.f32.mxu1 %vm3964_vm7, %v3963_v3  ;;  %3697 = vmatpush3.msra.mxu1 %v1168_v37 }
 0x14f   :  { %3701 = vmatprep.subr.mxu1 %v3963_v3 }
 0x1c3   :  { %v729_v49 = vpop.f32.mrf.mxu0 }
 0x1c5   :  { %v3555_v50 = vpop.f32.mrf.mxu0 }
 0x1cb   :  { %v578_v56 = vpop.f32.mrf.mxu1 }
 0x1cc   :  { %v730_v28 = vadd.f32 %v729_v49, %v578_v56 }
 0x1cd   :  { %v3520_v10 = vpop.f32.mrf.mxu1 }
 0x1ce   :  { %v1593_v10 = vsub.s32 0, %v4044_v7 }
 0x1e3   :  { %v922_v57 = vpop.f32.mrf.mxu0 }
 0x1e5   :  { %v3625_v63 = vpop.f32.mrf.mxu0 }
 0x1e6   :  { %v3132_v63 = vld [vmem:[%s5075_s7] ss:$0 sm:$0xff] }
 0x1ec   :  { %v833_v2 = vpop.f32.mrf.mxu1 }
 0x1ed   :  { %v834_v45 = vadd.f32 %v833_v2, %v730_v28  ;;  %v1609_v2 = vsub.s32 1, %v4044_v7  ;;  %v3960_v7 = vld [vmem:[%s5071_s0 + $0x8] sm:$0xff] }
 0x1ee   :  { %v3590_v15 = vpop.f32.mrf.mxu1 }
 0x1ef   :  { %v923_v46 = vadd.f32 %v922_v57, %v834_v45 }
 0x205   :  { %v1128_v19 = vpop.f32.mrf.mxu0 }
 0x207   :  { %v3695_v33 = vpop.f32.mrf.mxu0 }
 0x20d   :  { %v1041_v59 = vpop.f32.mrf.mxu1 }
 0x20e   :  { %v1042_v60 = vadd.f32 %v1041_v59, %v923_v46 }
 0x20f   :  { %v3660_v13 = vpop.f32.mrf.mxu1 }
 0x210   :  { %v1129_v20 = vadd.f32 %v1128_v19, %v1042_v60  ;;  %v3133_v60 = vld [vmem:[%s5076_s8] ss:$0 sm:$0xff] }
 0x212   :  { %v1135_v54 = vsel %vm1133_vm9, %v1129_v20, 0 }
 0x213   :  { %v1203_v61 = vand.u32 4294901760, %v1135_v54 }
 0x215   :  { %v1204_v9 = vsub.f32 %v1135_v54, %v1203_v61  ;;  %3719 = vmatmul.mubr.f32.vlgmr.msra.gmra.mxu0 %v1203_v61 }
 0x216   :  { %3727 = vmatpush3.msra.mxu0 %v3145_v40 }
 0x217   :  { %v1205_v34 = vand.u32 4294901760, %v1204_v9  ;;  %3728 = vmatprep.subr.mxu0 %v3144_v48 }
 0x218   :  { %3729 = vmatpush3.msra.mxu0 %v3144_v48 }
 0x219   :  { %v1206_v38 = vsub.f32 %v1204_v9, %v1205_v34  ;;  %3730 = vmatprep.subr.mxu0 %v3143_v55 }
 0x21a   :  { %3731 = vmatpush3.msra.mxu0 %v3143_v55 }
 0x21b   :  { %v1207_v14 = vand.u32 4294901760, %v1206_v38  ;;  %3732 = vmatprep.subr.mxu0 %v3142_v25 }
 0x21c   :  { %3733 = vmatpush3.msra.mxu0 %v3142_v25  ;;  %v3139_v25 = vld [vmem:[%s5074_s2 + $0x48] sm:$0xff] }
 0x21d   :  { %3699 = vmatmul.mubr.f32.vlgmr.msra.gmra.mxu1 %v1207_v14  ;;  %3734 = vmatprep.subr.mxu0 %v3141_v22 }
 0x21e   :  { %3702 = vmatpush3.msra.mxu1 %v1248_v39  ;;  %3703 = vmatprep.mubr.msk.f32.mxu1 %vm3964_vm7, %v3963_v3 }
 0x21f   :  { %3706 = vmatprep.subr.mxu1 %v3963_v3  ;;  %3735 = vmatpush3.msra.mxu0 %v3141_v22  ;;  %v3138_v22 = vld [vmem:[%s5074_s2 + $0x40] sm:$0xff] }
 0x220   :  { %3736 = vmatprep.subr.mxu0 %v3140_v16 }
 0x221   :  { %3704 = vmatmul.mubr.f32.vlgmr.msra.gmra.mxu1 %v1203_v61  ;;  %3737 = vmatpush3.msra.mxu0 %v3140_v16  ;;  %v1696_v16 = vld [vmem:[%s5074_s2 + $0x10] sm:$0xff] }
 0x222   :  { %3707 = vmatpush3.msra.mxu1 %v1245_v42  ;;  %3708 = vmatprep.mubr.msk.f32.mxu1 %vm3964_vm7, %v3963_v3 }
 0x223   :  { %3711 = vmatprep.subr.mxu1 %v3963_v3  ;;  %3738 = vmatprep.subr.mxu0 %v3139_v25 }
 0x224   :  { %3739 = vmatpush3.msra.mxu0 %v3139_v25  ;;  %v2049_v25 = vld [vmem:[%s5077_s5 + $0x18] sm:$0xff] }
 0x225   :  { %3709 = vmatmul.mubr.f32.vlgmr.msra.gmra.mxu1 %v1204_v9  ;;  %3740 = vmatprep.subr.mxu0 %v3138_v22 }
 0x226   :  { %3712 = vmatpush3.msra.mxu1 %v1168_v37  ;;  %3713 = vmatprep.mubr.msk.f32.mxu1 %vm3964_vm7, %v3963_v3 }
 0x227   :  { %3721 = vmatprep.subr.mxu1 %v3963_v3  ;;  %3741 = vmatpush3.msra.mxu0 %v3138_v22 }
 0x229   :  { %3714 = vmatmul.mubr.f32.vlgmr.msra.gmra.mxu1 %v1205_v34 }
 0x22a   :  { %3722 = vmatpush3.msra.mxu1 %v1168_v37  ;;  %3723 = vmatprep.mubr.msk.f32.mxu1 %vm3964_vm7, %v3963_v3 }
 0x22b   :  { %3748 = vmatprep.subr.mxu1 %v1701_v8 }
 0x22d   :  { %3724 = vmatmul.mubr.f32.vlgmr.msra.gmra.mxu1 %v1203_v61 }
 0x22e   :  { %3749 = vmatpush3.msra.mxu1 %v1701_v8 }
 0x22f   :  { %3750 = vmatprep.subr.mxu1 %v1700_v41 }
 0x230   :  { %3751 = vmatpush3.msra.mxu1 %v1700_v41 }
 0x231   :  { %3752 = vmatprep.subr.mxu1 %v1699_v47 }
 0x232   :  { %3753 = vmatpush3.msra.mxu1 %v1699_v47 }
 0x233   :  { %3754 = vmatprep.subr.mxu1 %v1698_v35 }
 0x234   :  { %3755 = vmatpush3.msra.mxu1 %v1698_v35  ;;  %v1697_v35 = vld [vmem:[%s5074_s2 + $0x18] sm:$0xff] }
 0x235   :  { %3756 = vmatprep.subr.mxu1 %v1697_v35 }
 0x236   :  { %3757 = vmatpush3.msra.mxu1 %v1697_v35 }
 0x237   :  { %3758 = vmatprep.subr.mxu1 %v1696_v16 }
 0x238   :  { %3759 = vmatpush3.msra.mxu1 %v1696_v16 }
 0x2d5   :  { %v1507_v62 = vpop.f32.mrf.mxu0 }
 0x2d7   :  { %v3720_v1 = vpop.f32.mrf.mxu0 }
 0x2d8   :  { %v3161_v1 = vld [vmem:[%s5074_s2 + $0xb8] sm:$0xff] }
 0x2d9   :  { %3770 = vmatprep.subr.mxu0 %v3161_v1 }
 0x2dd   :  { %v1209_v0 = vpop.f32.mrf.mxu1 }
 0x2df   :  { %v3700_v4 = vpop.f32.mrf.mxu1 }
 0x2e1   :  { %v1285_v5 = vpop.f32.mrf.mxu1 }
 0x2e2   :  { %v1286_v12 = vadd.f32 %v1285_v5, %v1209_v0  ;;  %v1694_v0 = vld [vmem:[%s5074_s2] sm:$0xff] }
 0x2e3   :  { %v3705_v6 = vpop.f32.mrf.mxu1 }
 0x2e5   :  { %v1359_v11 = vpop.f32.mrf.mxu1 }
 0x2e6   :  { %v1360_v18 = vadd.f32 %v1359_v11, %v1286_v12 }
 0x2e7   :  { %v3710_v17 = vpop.f32.mrf.mxu1 }
 0x2e9   :  { %v1433_v23 = vpop.f32.mrf.mxu1 }
 0x2ea   :  { %v1434_v24 = vadd.f32 %v1433_v23, %v1360_v18 }
 0x2eb   :  { %v3715_v29 = vpop.f32.mrf.mxu1 }
 0x2ec   :  { %v1508_v30 = vadd.f32 %v1507_v62, %v1434_v24  ;;  %v1695_v62 = vld [vmem:[%s5074_s2 + $0x8] sm:$0xff] }
 0x2ed   :  { %v1579_v31 = vpop.f32.mrf.mxu1  ;;  %3760 = vmatprep.subr.mxu1 %v1695_v62 }
 0x2ee   :  { %v1580_v36 = vadd.f32 %v1579_v31, %v1508_v30  ;;  %3761 = vmatpush3.msra.mxu1 %v1695_v62 }
 0x2ef   :  { %v3725_v37 = vpop.f32.mrf.mxu1  ;;  %3762 = vmatprep.subr.mxu1 %v1694_v0 }
 0x2f0   :  { %v1583_v42 = vmul.f32 %v1580_v36, %v1580_v36  ;;  %v1594_v57 = vrot.slane %v1580_v36, %v1593_v10  ;;  %3763 = vmatpush3.msra.mxu1 %v1694_v0  ;;  %v2048_v0 = vld [vmem:[%s5077_s5 + $0x10] sm:$0xff] }
 0x2f1   :  { %3792 = vmatprep.subr.mxu1 %v3963_v3 }
 0x2f2   :  { %v1585_v43 = vrot.slane %v1583_v42, 7  ;;  %v1595_v28 = vsub.f32 %v4438_v27, %v1594_v57  ;;  %v1596_v33 = vsub.f32 %v4436_v44, %v1594_v57  ;;  %v1597_v45 = vsub.f32 %v4448_v53, %v1594_v57 }
 0x2f3   :  { %v1598_v46 = vsub.f32 %v4446_v52, %v1594_v57 }
 0x2f4   :  { %v1587_v49 = vsub.f32 %v1580_v36, %v1585_v43 }
 0x2f6   :  { %v1588_v50 = vmax.f32 %v1587_v49, 0.0 }
 0x2f8   :  { %v1589_v56 = vadd.f32 1e-05, %v1588_v50  ;;  %v3160_v50 = vld [vmem:[%s5074_s2 + $0xb0] sm:$0xff] }
 0x2fa   :  { %3939 = vrsqrt.f32 %v1589_v56 }
 0x307   :  { %v3940_v15 = vpop.eup %3939 }
 0x308   :  { %v1606_v19 = vmul.f32 %v3940_v15, %v3132_v63  ;;  %v3159_v63 = vld [vmem:[%s5074_s2 + $0xa8] sm:$0xff] }
 0x30a   :  { %v1610_v59 = vrot.slane %v1606_v19, %v1609_v2 }
 0x30c   :  { %v1611_v13 = vmul.f32 %v1610_v59, %v1595_v28  ;;  %v1612_v20 = vmul.f32 %v1610_v59, %v1596_v33  ;;  %v1613_v54 = vmul.f32 %v1610_v59, %v1597_v45  ;;  %v1614_v61 = vmul.f32 %v1610_v59, %v1598_v46  ;;  %v3158_v33 = vld [vmem:[%s5074_s2 + $0xa0] sm:$0xff]  ;;  %v3157_v46 = vld [vmem:[%s5074_s2 + $0x98] sm:$0xff]  ;;  %v3156_v59 = vld [vmem:[%s5074_s2 + $0x90] sm:$0xff] }
 0x30e   :  { %v1622_v9 = vadd.f32 %v3133_v60, %v1611_v13  ;;  %v4685_v21 = vadd.f32 %v3133_v60, %v1612_v20  ;;  %v1624_v27 = vadd.f32 %v3133_v60, %v1613_v54  ;;  %v1625_v44 = vadd.f32 %v3133_v60, %v1614_v61  ;;  %v3155_v13 = vld [vmem:[%s5074_s2 + $0x88] sm:$0xff]  ;;  %v3154_v20 = vld [vmem:[%s5074_s2 + $0x80] sm:$0xff] }
 0x310   :  { %v3135_v53 = vmul.f32 -1.442695, %v4685_v21  ;;  %v3136_v34 = vmul.f32 -1.442695, %v1624_v27  ;;  %v3137_v52 = vmul.f32 -1.442695, %v1625_v44 }
 0x311   :  { %v3134_v38 = vmul.f32 -1.442695, %v1622_v9 }
 0x312   :  { %3941 = vpow2.f32 %v3135_v53  ;;  %v4776_v53 = vand.u32 4294901760, %v2053_v51 }
 0x313   :  { %3943 = vpow2.f32 %v3136_v34  ;;  %v2052_v34 = vld [vmem:[%s5077_s5 + $0x30] sm:$0xff] }
 0x314   :  { %3945 = vpow2.f32 %v3137_v52  ;;  %v4782_v52 = vsub.f32 %v2053_v51, %v4776_v53  ;;  %v4784_v58 = vand.u32 4294901760, %v2052_v34 }
 0x315   :  { %3947 = vpow2.f32 %v3134_v38  ;;  %v2051_v38 = vld [vmem:[%s5077_s5 + $0x28] sm:$0xff] }
 0x31f   :  { %v3942_v39 = vpop.eup %3941 }
 0x320   :  { %v3944_v14 = vpop.eup %3943  ;;  %v1639_v47 = vadd.f32 1.0, %v3942_v39  ;;  %v2159_v39 = vand.u32 4294901760, %v4782_v52 }
 0x321   :  { %v3946_v40 = vpop.eup %3945  ;;  %v1640_v55 = vadd.f32 1.0, %v3944_v14  ;;  %v4793_v14 = vsub.f32 %v2052_v34, %v4784_v58 }
 0x322   :  { %v3948_v48 = vpop.eup %3947  ;;  %v1641_v8 = vadd.f32 1.0, %v3946_v40  ;;  %v4795_v40 = vand.u32 4294901760, %v2051_v38 }
 0x323   :  { %v1638_v41 = vadd.f32 1.0, %v3948_v48  ;;  %v2050_v48 = vld [vmem:[%s5077_s5 + $0x20] sm:$0xff] }
 0x324   :  { %3949 = vrcp.f32 %v1641_v8  ;;  %v2160_v8 = vsub.f32 %v4782_v52, %v2159_v39 }
 0x325   :  { %3951 = vrcp.f32 %v1638_v41  ;;  %v2166_v41 = vand.u32 4294901760, %v4793_v14 }
 0x326   :  { %3953 = vrcp.f32 %v1640_v55  ;;  %v4807_v55 = vsub.f32 %v2051_v38, %v4795_v40  ;;  %v2161_v35 = vand.u32 4294901760, %v2160_v8 }
 0x327   :  { %3955 = vrcp.f32 %v1639_v47  ;;  %v4809_v47 = vand.u32 4294901760, %v2050_v48  ;;  %v2167_v22 = vsub.f32 %v4793_v14, %v2166_v41 }
 0x328   :  { %v2173_v16 = vand.u32 4294901760, %v4807_v55 }
 0x329   :  { %v4821_v62 = vsub.f32 %v2050_v48, %v4809_v47 }
 0x331   :  { %v3950_v4 = vpop.eup %3949 }
 0x332   :  { %v3952_v5 = vpop.eup %3951  ;;  %1660 = vrot.lane.b32.xlu1 %v3950_v4, %s3965_s21  ;;  %v2168_v4 = vand.u32 4294901760, %v2167_v22 }
 0x333   :  { %1654 = vrot.lane.b32.xlu0 %v3952_v5, %s3965_s21  ;;  %v3954_v6 = vpop.eup %3953  ;;  %v2174_v5 = vsub.f32 %v4807_v55, %v2173_v16 }
 0x334   :  { %v3956_v11 = vpop.eup %3955 }
 0x336   :  { %1658 = vrot.lane.b32.xlu1 %v3954_v6, %s3965_s21  ;;  %v2180_v6 = vand.u32 4294901760, %v4821_v62 }
 0x337   :  { %1656 = vrot.lane.b32.xlu0 %v3956_v11, %s3965_s21  ;;  %v4834_v11 = vand.u32 4294901760, %v2048_v0 }
 0x3a4   :  { %v1661_v12 = vpop.permute.xlu1 %1660 }
 0x3a5   :  { %v1669_v17 = vmul.f32 %v1661_v12, %v1625_v44  ;;  %v1655_v18 = vpop.permute.xlu0 %1654 }
 0x3a6   :  { %v1666_v23 = vmul.f32 %v1655_v18, %v1622_v9  ;;  %v2175_v18 = vand.u32 4294901760, %v2174_v5 }
 0x3a7   :  { %v1673_v24 = vrot.slane %v1669_v17, 7  ;;  %v1685_v54 = vrot.slane %v1669_v17, 1 }
 0x3a8   :  { %v1670_v29 = vrot.slane %v1666_v23, 7  ;;  %3742 = vmatprep.mubr.msk.f32.mxu0 %vm146_vm2, %v1666_v23  ;;  %v1659_v30 = vpop.permute.xlu1 %1658  ;;  %v1682_v19 = vrot.slane %v1666_v23, 1  ;;  %v2181_v23 = vsub.f32 %v4821_v62, %v2180_v6 }
 0x3a9   :  { %v1668_v31 = vmul.f32 %v1659_v30, %v1624_v27  ;;  %v1657_v36 = vpop.permute.xlu0 %1656 }
 0x3aa   :  { %v1667_v37 = vmul.f32 %v1657_v36, %v4685_v21  ;;  %v1677_v42 = vsel %vm107_vm0, %v1673_v24, %v1670_v29  ;;  %v1689_v27 = vsel %vm120_vm4, %v1685_v54, %v1682_v19  ;;  %v2182_v36 = vand.u32 4294901760, %v2181_v23 }
 0x3ab   :  { %v1672_v43 = vrot.slane %v1668_v31, 7  ;;  %v1678_v49 = vsel %vm4096_vm1, %v1677_v42, 0.0  ;;  %v1684_v60 = vrot.slane %v1668_v31, 1  ;;  %v1693_v44 = vsel %vm4179_vm6, %v1689_v27, 0.0 }
 0x3ac   :  { %v1671_v56 = vrot.slane %v1667_v37, 7  ;;  %3743 = vmatmul.mubr.msk.f32.vlgmr.msra.gmra.mxu0 %vm146_vm2, %v1667_v37  ;;  %3764 = vmatprep.mubr.msk.f32.mxu1 %vm146_vm2, %v1678_v49  ;;  %v1683_v57 = vrot.slane %v1667_v37, 1 }
 0x3ad   :  { %3771 = vmatpush3.msra.mxu0 %v3161_v1  ;;  %3745 = vmatprep.mubr.msk.f32.mxu0 %vm146_vm2, %v1668_v31  ;;  %v1674_v32 = vsel %vm107_vm0, %v1672_v43, %v1673_v24  ;;  %v1686_v21 = vsel %vm120_vm4, %v1684_v60, %v1685_v54  ;;  %v4824_v1 = vand.u32 4294901760, %v2049_v25  ;;  %v4848_v24 = vsub.f32 %v2048_v0, %v4834_v11  ;;  %v2046_v31 = vld [vmem:[%s5077_s5] sm:$0xff] }
 0x3ae   :  { %3772 = vmatprep.subr.mxu0 %v3160_v50  ;;  %v1676_v26 = vsel %vm107_vm0, %v1670_v29, %v1671_v56  ;;  %v1675_v15 = vsel %vm107_vm0, %v1671_v56, %v1672_v43  ;;  %v1688_v45 = vsel %vm120_vm4, %v1682_v19, %v1683_v57  ;;  %v1687_v61 = vsel %vm120_vm4, %v1683_v57, %v1684_v60 }
 0x3af   :  { %3773 = vmatpush3.msra.mxu0 %v3160_v50  ;;  %3765 = vmatmul.mubr.msk.f32.vlgmr.msra.gmra.mxu1 %vm146_vm2, %v1676_v26  ;;  %v1680_v28 = vsel %vm4111_vm3, %v1675_v15, 0.0  ;;  %v1691_v9 = vsel %vm4165_vm5, %v1687_v61, 0.0  ;;  %v4838_v12 = vsub.f32 %v2049_v25, %v4824_v1  ;;  %v2194_v37 = vand.u32 4294901760, %v4848_v24 }
 0x3b0   :  { %3774 = vmatprep.subr.mxu0 %v3159_v63  ;;  %3746 = vmatmul.mubr.msk.f32.gmra.mxu0 %vm146_vm2, %v1669_v17  ;;  %v2047_v17 = vld [vmem:[%s5077_s5 + $0x8] sm:$0xff]  ;;  %v4863_v43 = vand.u32 4294901760, %v2046_v31 }
 0x3b1   :  { %3767 = vmatprep.mubr.msk.f32.mxu1 %vm146_vm2, %v1680_v28  ;;  %3775 = vmatpush3.msra.mxu0 %v3159_v63  ;;  %v4850_v29 = vand.u32 4294901760, %v2047_v17  ;;  %v2187_v30 = vand.u32 4294901760, %v4838_v12  ;;  %v2195_v50 = vsub.f32 %v4848_v24, %v2194_v37 }
 0x3b2   :  { %3776 = vmatprep.subr.mxu0 %v3158_v33  ;;  %3786 = vmatprep.mubr.msk.f32.mxu0 %vm146_vm2, %v1688_v45  ;;  %v4876_v57 = vsub.f32 %v2046_v31, %v4863_v43 }
 0x3b3   :  { %3777 = vmatpush3.msra.mxu0 %v3158_v33  ;;  %3768 = vmatmul.mubr.msk.f32.gmra.mxu1 %vm146_vm2, %v1674_v32  ;;  %v4861_v42 = vsub.f32 %v2047_v17, %v4850_v29  ;;  %v2188_v49 = vsub.f32 %v4838_v12, %v2187_v30  ;;  %v2196_v26 = vand.u32 4294901760, %v2195_v50 }
 0x3b4   :  { %3778 = vmatprep.subr.mxu0 %v3157_v46  ;;  %3808 = vmatprep.mubr.msk.f32.mxu1 %vm3964_vm7, %v3963_v3  ;;  %v2208_v19 = vand.u32 4294901760, %v4876_v57 }
 0x3b5   :  { %3779 = vmatpush3.msra.mxu0 %v3157_v46  ;;  %3793 = vmatpush3.msra.mxu1 %v4776_v53  ;;  %v2201_v56 = vand.u32 4294901760, %v4861_v42  ;;  %v2189_v63 = vand.u32 4294901760, %v2188_v49 }
 0x3b6   :  { %3780 = vmatprep.subr.mxu0 %v3156_v59  ;;  %3794 = vmatprep.subr.mxu1 %v3963_v3  ;;  %v2209_v33 = vsub.f32 %v4876_v57, %v2208_v19 }
 0x3b7   :  { %3781 = vmatpush3.msra.mxu0 %v3156_v59  ;;  %3795 = vmatpush3.msra.mxu1 %v4784_v58  ;;  %v2202_v15 = vsub.f32 %v4861_v42, %v2201_v56 }
 0x3b8   :  { %3782 = vmatprep.subr.mxu0 %v3155_v13  ;;  %3796 = vmatprep.subr.mxu1 %v3963_v3  ;;  %v2210_v45 = vand.u32 4294901760, %v2209_v33 }
 0x3b9   :  { %3783 = vmatpush3.msra.mxu0 %v3155_v13  ;;  %3797 = vmatpush3.msra.mxu1 %v4795_v40  ;;  %v2203_v28 = vand.u32 4294901760, %v2202_v15 }
 0x3ba   :  { %3784 = vmatprep.subr.mxu0 %v3154_v20  ;;  %3798 = vmatprep.subr.mxu1 %v3963_v3 }
 0x3bb   :  { %3785 = vmatpush3.msra.mxu0 %v3154_v20  ;;  %3799 = vmatpush3.msra.mxu1 %v4809_v47 }
 0x3bc   :  { %3787 = vmatmul.mubr.msk.f32.vlgmr.msra.gmra.mxu0 %vm146_vm2, %v1691_v9  ;;  %3811 = vmatprep.subr.mxu0 %v3963_v3 }
 0x3bd   :  { %3789 = vmatprep.mubr.msk.f32.mxu0 %vm146_vm2, %v1686_v21  ;;  %3800 = vmatprep.subr.mxu1 %v3963_v3 }
 0x3be   :  { %3812 = vmatpush3.msra.mxu0 %v2161_v35  ;;  %3801 = vmatpush3.msra.mxu1 %v4824_v1 }
 0x3bf   :  { %3813 = vmatprep.subr.mxu0 %v3963_v3  ;;  %3802 = vmatprep.subr.mxu1 %v3963_v3 }
 0x3c0   :  { %3790 = vmatmul.mubr.msk.f32.gmra.mxu0 %vm146_vm2, %v1693_v44  ;;  %3803 = vmatpush3.msra.mxu1 %v4834_v11 }
 0x3c1   :  { %3827 = vmatprep.mubr.msk.f32.mxu0 %vm3964_vm7, %v3963_v3  ;;  %3814 = vmatpush3.msra.mxu0 %v2168_v4 }
 0x3c2   :  { %3815 = vmatprep.subr.mxu0 %v3963_v3  ;;  %3804 = vmatprep.subr.mxu1 %v3963_v3 }
 0x3c3   :  { %3816 = vmatpush3.msra.mxu0 %v2175_v18  ;;  %3805 = vmatpush3.msra.mxu1 %v4850_v29 }
 0x3c4   :  { %3817 = vmatprep.subr.mxu0 %v3963_v3  ;;  %3806 = vmatprep.subr.mxu1 %v3963_v3 }
 0x3c5   :  { %3818 = vmatpush3.msra.mxu0 %v2182_v36  ;;  %3807 = vmatpush3.msra.mxu1 %v4863_v43 }
 0x3c6   :  { %3819 = vmatprep.subr.mxu0 %v3963_v3  ;;  %3830 = vmatprep.subr.mxu1 %v3963_v3 }
 0x3c7   :  { %3820 = vmatpush3.msra.mxu0 %v2189_v63 }
 0x3c8   :  { %3821 = vmatprep.subr.mxu0 %v3963_v3 }
 0x3c9   :  { %3822 = vmatpush3.msra.mxu0 %v2196_v26 }
 0x3ca   :  { %3823 = vmatprep.subr.mxu0 %v3963_v3 }
 0x3cb   :  { %3824 = vmatpush3.msra.mxu0 %v2203_v28 }
 0x3cc   :  { %3825 = vmatprep.subr.mxu0 %v3963_v3 }
 0x3cd   :  { %3826 = vmatpush3.msra.mxu0 %v2210_v45 }
 0x3ce   :  { %3849 = vmatprep.subr.mxu0 %v3963_v3 }
 0x46c   :  { %v3744_v46 = vpop.f32.mrf.mxu0 }
 0x46e   :  { %v1789_v59 = vpop.f32.mrf.mxu0 }
 0x46f   :  { %v3766_v32 = vpop.f32.mrf.mxu1 }
 0x470   :  { %v3747_v13 = vpop.f32.mrf.mxu0  ;;  %v1892_v61 = vadd.f32 %v3766_v32, %v3744_v46 }
 0x471   :  { %v1886_v60 = vpop.f32.mrf.mxu1 }
 0x472   :  { %v1799_v54 = vpop.f32.mrf.mxu0  ;;  %v1887_v21 = vadd.f32 %v1886_v60, %v1789_v59 }
 0x473   :  { %v3769_v20 = vpop.f32.mrf.mxu1 }
 0x474   :  { %v1902_v34 = vadd.f32 %v3769_v20, %v3747_v13 }
 0x475   :  { %v1896_v27 = vpop.f32.mrf.mxu1 }
 0x476   :  { %v1897_v48 = vadd.f32 %v1896_v27, %v1799_v54 }
 0x47c   :  { %v3788_v9 = vpop.f32.mrf.mxu0 }
 0x47d   :  { %v4893_v44 = vadd.f32 %v3788_v9, %v1892_v61 }
 0x47e   :  { %v1992_v51 = vpop.f32.mrf.mxu0 }
 0x47f   :  { %v4895_v38 = vadd.f32 %v1992_v51, %v1887_v21  ;;  %v2029_v25 = vmul.f32 %v4893_v44, %v4893_v44  ;;  %v2016_v5 = vsel %vm146_vm2, %v4893_v44, 0.0 }
 0x480   :  { %v3791_v8 = vpop.f32.mrf.mxu0 }
 0x481   :  { %v2015_v35 = vsel %vm146_vm2, %v4895_v38, 0.0  ;;  %v2028_v22 = vmul.f32 %v4895_v38, %v4895_v38  ;;  %v4903_v0 = vadd.f32 %v3791_v8, %v1902_v34  ;;  %v2033_v31 = vsel %vm146_vm2, %v2029_v25, 0.0 }
 0x482   :  { %v2002_v4 = vpop.f32.mrf.mxu0  ;;  %v2017_v23 = vadd.f32 %v2016_v5, %v2015_v35 }
 0x483   :  { %v2032_v17 = vsel %vm146_vm2, %v2028_v22, 0.0  ;;  %v4908_v18 = vadd.f32 %v2002_v4, %v1897_v48  ;;  %v2031_v36 = vmul.f32 %v4903_v0, %v4903_v0  ;;  %v2020_v15 = vsel %vm146_vm2, %v4903_v0, 0.0 }
 0x484   :  { %v2034_v63 = vadd.f32 %v2033_v31, %v2032_v17 }
 0x485   :  { %v2018_v49 = vsel %vm146_vm2, %v4908_v18, 0.0  ;;  %v2030_v50 = vmul.f32 %v4908_v18, %v4908_v18  ;;  %v2037_v46 = vsel %vm146_vm2, %v2031_v36, 0.0 }
 0x486   :  { %v2019_v26 = vadd.f32 %v2018_v49, %v2017_v23 }
 0x487   :  { %v2035_v28 = vsel %vm146_vm2, %v2030_v50, 0.0 }
 0x488   :  { %v2021_v33 = vadd.f32 %v2020_v15, %v2019_v26  ;;  %v2036_v45 = vadd.f32 %v2035_v28, %v2034_v63 }
 0x48a   :  { %v2022_v32 = vrot.slane %v2021_v33, 4  ;;  %v2038_v59 = vadd.f32 %v2037_v46, %v2036_v45 }
 0x48c   :  { %v2023_v60 = vadd.f32 %v2022_v32, %v2021_v33  ;;  %v2039_v13 = vrot.slane %v2038_v59, 4 }
 0x48e   :  { %v2024_v20 = vrot.slane %v2023_v60, 2  ;;  %v2040_v54 = vadd.f32 %v2039_v13, %v2038_v59 }
 0x490   :  { %v2025_v61 = vadd.f32 %v2024_v20, %v2023_v60  ;;  %v2041_v9 = vrot.slane %v2040_v54, 2 }
 0x492   :  { %v2026_v21 = vrot.slane %v2025_v61, 1  ;;  %v2042_v27 = vadd.f32 %v2041_v9, %v2040_v54 }
 0x494   :  { %v2043_v51 = vrot.slane %v2042_v27, 1  ;;  %v2027_v34 = vadd.f32 %v2026_v21, %v2025_v61 }
 0x496   :  { %v2044_v48 = vadd.f32 %v2043_v51, %v2042_v27 }
 0x498   :  { %v2045_v8 = vsel %vm473_vm8, %v2027_v34, %v2044_v48 }
 0x499   :  { %v2055_v25 = vsel %vm146_vm2, %v2045_v8, 0 }
 0x49a   :  { %v4923_v35 = vand.u32 4294901760, %v2055_v25 }
 0x49c   :  { %v2131_v22 = vsub.f32 %v2055_v25, %v4923_v35  ;;  %3828 = vmatmul.mubr.f32.vlgmr.msra.gmra.mxu0 %v4923_v35 }
 0x49d   :  { %3850 = vmatpush3.msra.mxu0 %v4776_v53  ;;  %3865 = vmatprep.mubr.msk.f32.mxu0 %vm3964_vm7, %v3963_v3 }
 0x49e   :  { %3851 = vmatprep.subr.mxu0 %v3963_v3  ;;  %v2132_v4 = vand.u32 4294901760, %v2131_v22 }
 0x49f   :  { %3852 = vmatpush3.msra.mxu0 %v4784_v58 }
 0x4a0   :  { %3853 = vmatprep.subr.mxu0 %v3963_v3  ;;  %v2133_v5 = vsub.f32 %v2131_v22, %v2132_v4 }
 0x4a1   :  { %3854 = vmatpush3.msra.mxu0 %v4795_v40 }
 0x4a2   :  { %3855 = vmatprep.subr.mxu0 %v3963_v3  ;;  %v2134_v17 = vand.u32 4294901760, %v2133_v5 }
 0x4a3   :  { %3856 = vmatpush3.msra.mxu0 %v4809_v47 }
 0x4a4   :  { %3857 = vmatprep.subr.mxu0 %v3963_v3  ;;  %3809 = vmatmul.mubr.f32.vlgmr.msra.gmra.mxu1 %v2134_v17 }
 0x4a5   :  { %3831 = vmatpush3.msra.mxu1 %v4782_v52  ;;  %3858 = vmatpush3.msra.mxu0 %v4824_v1 }
 0x4a6   :  { %3832 = vmatprep.subr.mxu1 %v3963_v3  ;;  %3859 = vmatprep.subr.mxu0 %v3963_v3 }
 0x4a7   :  { %3833 = vmatpush3.msra.mxu1 %v4793_v14  ;;  %3860 = vmatpush3.msra.mxu0 %v4834_v11 }
 0x4a8   :  { %3834 = vmatprep.subr.mxu1 %v3963_v3  ;;  %3861 = vmatprep.subr.mxu0 %v3963_v3 }
 0x4a9   :  { %3835 = vmatpush3.msra.mxu1 %v4807_v55  ;;  %3862 = vmatpush3.msra.mxu0 %v4850_v29 }
 0x4aa   :  { %3836 = vmatprep.subr.mxu1 %v3963_v3  ;;  %3863 = vmatprep.subr.mxu0 %v3963_v3 }
 0x4ab   :  { %3837 = vmatpush3.msra.mxu1 %v4821_v62  ;;  %3864 = vmatpush3.msra.mxu0 %v4863_v43 }
 0x4ac   :  { %3838 = vmatprep.subr.mxu1 %v3963_v3  ;;  %3866 = vmatmul.mubr.f32.vlgmr.msra.gmra.mxu0 %v2132_v4 }
 0x4ad   :  { %3887 = vmatprep.subr.mxu0 %v3963_v3  ;;  %3839 = vmatpush3.msra.mxu1 %v4838_v12 }
 0x4ae   :  { %3888 = vmatpush3.msra.mxu0 %v4776_v53  ;;  %3840 = vmatprep.subr.mxu1 %v3963_v3  ;;  %v2594_v53 = vld [vmem:[%s5078_s6] sm:$0xf] }
 0x4af   :  { %3889 = vmatprep.subr.mxu0 %v3963_v3  ;;  %3841 = vmatpush3.msra.mxu1 %v4848_v24  ;;  %v2601_v52 = vsel %vm2599_vm10, %v2594_v53, 0 }
 0x4b0   :  { %3890 = vmatpush3.msra.mxu0 %v4784_v58  ;;  %3842 = vmatprep.subr.mxu1 %v3963_v3  ;;  %v2634_v58 = vand.u32 4294901760, %v2601_v52 }
 0x4b1   :  { %3891 = vmatprep.subr.mxu0 %v3963_v3  ;;  %3843 = vmatpush3.msra.mxu1 %v4861_v42 }
 0x4b2   :  { %3892 = vmatpush3.msra.mxu0 %v4795_v40  ;;  %3844 = vmatprep.subr.mxu1 %v3963_v3 }
 0x4b3   :  { %3893 = vmatprep.subr.mxu0 %v3963_v3  ;;  %3845 = vmatpush3.msra.mxu1 %v4876_v57 }
 0x4b4   :  { %3846 = vmatprep.mubr.msk.f32.mxu1 %vm3964_vm7, %v3963_v3  ;;  %3894 = vmatpush3.msra.mxu0 %v4809_v47 }
 0x4b5   :  { %3847 = vmatmul.mubr.f32.vlgmr.msra.gmra.mxu1 %v2131_v22  ;;  %3868 = vmatprep.subr.mxu1 %v3963_v3  ;;  %v3166_v22 = vld [vmem:[%s5079_s9] ss:$0 sm:$0xff] }
 0x4b6   :  { %3895 = vmatprep.subr.mxu0 %v3963_v3  ;;  %3869 = vmatpush3.msra.mxu1 %v2159_v39  ;;  %v2711_v39 = vsub.f32 %v2601_v52, %v2634_v58 }
 0x4b7   :  { %3896 = vmatpush3.msra.mxu0 %v4824_v1  ;;  %3870 = vmatprep.subr.mxu1 %v3963_v3 }
 0x4b8   :  { %3897 = vmatprep.subr.mxu0 %v3963_v3  ;;  %3871 = vmatpush3.msra.mxu1 %v2166_v41  ;;  %v2712_v14 = vand.u32 4294901760, %v2711_v39 }
 0x4b9   :  { %3898 = vmatpush3.msra.mxu0 %v4834_v11  ;;  %3872 = vmatprep.subr.mxu1 %v3963_v3 }
 0x4ba   :  { %3899 = vmatprep.subr.mxu0 %v3963_v3  ;;  %3873 = vmatpush3.msra.mxu1 %v2173_v16  ;;  %v2713_v31 = vsub.f32 %v2711_v39, %v2712_v14 }
 0x4bb   :  { %3900 = vmatpush3.msra.mxu0 %v4850_v29  ;;  %3874 = vmatprep.subr.mxu1 %v3963_v3 }
 0x4bc   :  { %3901 = vmatprep.subr.mxu0 %v3963_v3  ;;  %3875 = vmatpush3.msra.mxu1 %v2180_v6  ;;  %v2714_v50 = vand.u32 4294901760, %v2713_v31 }
 0x4bd   :  { %3902 = vmatpush3.msra.mxu0 %v4863_v43  ;;  %3903 = vmatprep.mubr.msk.f32.mxu0 %vm3964_vm7, %v3963_v3 }
 0x4be   :  { %3876 = vmatprep.subr.mxu1 %v3963_v3  ;;  %3904 = vmatmul.mubr.f32.vlgmr.msra.gmra.mxu0 %v4923_v35 }
 0x4bf   :  { %3877 = vmatpush3.msra.mxu1 %v2187_v30  ;;  %3884 = vmatprep.mubr.msk.f32.mxu1 %vm3964_vm7, %v3963_v3 }
 0x4c0   :  { %3878 = vmatprep.subr.mxu1 %v3963_v3  ;;  %3926 = vmatprep.subr.mxu0 %v3963_v3 }
 0x4c1   :  { %3879 = vmatpush3.msra.mxu1 %v2194_v37  ;;  %3928 = vmatprep.mubr.msk.f32.mxu0 %vm3964_vm7, %v3963_v3 }
 0x4c2   :  { %3880 = vmatprep.subr.mxu1 %v3963_v3  ;;  %3927 = vmatpush3.msra.mxu0 %v2712_v14 }
 0x4c3   :  { %3881 = vmatpush3.msra.mxu1 %v2201_v56 }
 0x4c4   :  { %3882 = vmatprep.subr.mxu1 %v3963_v3 }
 0x4c5   :  { %3883 = vmatpush3.msra.mxu1 %v2208_v19 }
 0x4c6   :  { %3885 = vmatmul.mubr.f32.vlgmr.msra.gmra.mxu1 %v4923_v35  ;;  %3906 = vmatprep.subr.mxu1 %v3963_v3 }
 0x4c7   :  { %3908 = vmatprep.mubr.msk.f32.mxu1 %vm3964_vm7, %v3963_v3  ;;  %3907 = vmatpush3.msra.mxu1 %v2634_v58 }
 0x4c8   :  { %3911 = vmatprep.subr.mxu1 %v3963_v3 }
 0x55c   :  { %v2247_v40 = vpop.f32.mrf.mxu0 }
 0x55e   :  { %v3829_v41 = vpop.f32.mrf.mxu0 }
 0x564   :  { %v2136_v55 = vpop.f32.mrf.mxu1 }
 0x565   :  { %v2248_v12 = vadd.f32 %v2247_v40, %v2136_v55 }
 0x566   :  { %v3810_v47 = vpop.f32.mrf.mxu1 }
 0x56c   :  { %v2416_v16 = vpop.f32.mrf.mxu0 }
 0x56e   :  { %v3867_v62 = vpop.f32.mrf.mxu0 }
 0x575   :  { %v2335_v1 = vpop.f32.mrf.mxu1 }
 0x576   :  { %v2336_v29 = vadd.f32 %v2335_v1, %v2248_v12 }
 0x577   :  { %v3848_v6 = vpop.f32.mrf.mxu1 }
 0x578   :  { %v2417_v30 = vadd.f32 %v2416_v16, %v2336_v29  ;;  %v3962_v6 = vld [vmem:[%s5071_s0 + $0x18] sm:$0xff] }
 0x57e   :  { %v2590_v11 = vpop.f32.mrf.mxu0 }
 0x580   :  { %v3905_v24 = vpop.f32.mrf.mxu0 }
 0x586   :  { %v2511_v37 = vpop.f32.mrf.mxu1 }
 0x587   :  { %v2512_v42 = vadd.f32 %v2511_v37, %v2417_v30 }
 0x588   :  { %v3886_v43 = vpop.f32.mrf.mxu1 }
 0x589   :  { %v2591_v56 = vadd.f32 %v2590_v11, %v2512_v42 }
 0x58b   :  { %v2597_v57 = vsel %vm2595_vm11, %v2591_v56, 0 }
 0x58c   :  { %v2669_v19 = vand.u32 4294901760, %v2597_v57 }
 0x58e   :  { %v2670_v23 = vsub.f32 %v2597_v57, %v2669_v19  ;;  %3929 = vmatmul.mubr.f32.vlgmr.msra.gmra.mxu0 %v2669_v19 }
 0x590   :  { %v2671_v36 = vand.u32 4294901760, %v2670_v23 }
 0x592   :  { %v2672_v49 = vsub.f32 %v2670_v23, %v2671_v36 }
 0x594   :  { %v2673_v63 = vand.u32 4294901760, %v2672_v49 }
 0x596   :  { %3909 = vmatmul.mubr.f32.vlgmr.msra.gmra.mxu1 %v2673_v63 }
 0x597   :  { %3912 = vmatpush3.msra.mxu1 %v2714_v50  ;;  %3913 = vmatprep.mubr.msk.f32.mxu1 %vm3964_vm7, %v3963_v3 }
 0x598   :  { %3916 = vmatprep.subr.mxu1 %v3963_v3 }
 0x59a   :  { %3914 = vmatmul.mubr.f32.vlgmr.msra.gmra.mxu1 %v2669_v19 }
 0x59b   :  { %3917 = vmatpush3.msra.mxu1 %v2711_v39  ;;  %3918 = vmatprep.mubr.msk.f32.mxu1 %vm3964_vm7, %v3963_v3 }
 0x59c   :  { %3921 = vmatprep.subr.mxu1 %v3963_v3 }
 0x59e   :  { %3919 = vmatmul.mubr.f32.vlgmr.msra.gmra.mxu1 %v2670_v23 }
 0x59f   :  { %3922 = vmatpush3.msra.mxu1 %v2634_v58  ;;  %3923 = vmatprep.mubr.msk.f32.mxu1 %vm3964_vm7, %v3963_v3 }
 0x5a0   :  { %3931 = vmatprep.subr.mxu1 %v3963_v3 }
 0x5a2   :  { %3924 = vmatmul.mubr.f32.vlgmr.msra.gmra.mxu1 %v2671_v36 }
 0x5a3   :  { %3932 = vmatpush3.msra.mxu1 %v2634_v58  ;;  %3933 = vmatprep.mubr.msk.f32.mxu1 %vm3964_vm7, %v3963_v3 }
 0x5a6   :  { %3934 = vmatmul.mubr.f32.vlgmr.msra.gmra.mxu1 %v2669_v19 }
 0x64e   :  { %v2973_v26 = vpop.f32.mrf.mxu0 }
 0x650   :  { %v3930_v15 = vpop.f32.mrf.mxu0 }
 0x656   :  { %v2675_v28 = vpop.f32.mrf.mxu1 }
 0x658   :  { %v3910_v33 = vpop.f32.mrf.mxu1 }
 0x65a   :  { %v2751_v45 = vpop.f32.mrf.mxu1 }
 0x65b   :  { %v2752_v59 = vadd.f32 %v2751_v45, %v2675_v28 }
 0x65c   :  { %v3915_v46 = vpop.f32.mrf.mxu1 }
 0x65e   :  { %v2825_v32 = vpop.f32.mrf.mxu1 }
 0x65f   :  { %v2826_v13 = vadd.f32 %v2825_v32, %v2752_v59 }
 0x660   :  { %v3920_v60 = vpop.f32.mrf.mxu1 }
 0x662   :  { %v2899_v20 = vpop.f32.mrf.mxu1 }
 0x663   :  { %v2900_v54 = vadd.f32 %v2899_v20, %v2826_v13 }
 0x664   :  { %v3925_v61 = vpop.f32.mrf.mxu1 }
 0x665   :  { %v2974_v9 = vadd.f32 %v2973_v26, %v2900_v54 }
 0x666   :  { %v3045_v21 = vpop.f32.mrf.mxu1 }
 0x667   :  { %v3046_v27 = vadd.f32 %v3045_v21, %v2974_v9 }
 0x668   :  { %v3935_v51 = vpop.f32.mrf.mxu1 }
 0x669   :  { %v3049_v34 = vmul.f32 %v3046_v27, %v3046_v27  ;;  %v3060_v35 = vrot.slane %v3046_v27, %v1593_v10  ;;  %v3167_v10 = vld [vmem:[%s5080_s10] ss:$0 sm:$0xff] }
 0x66b   :  { %v3051_v3 = vrot.slane %v3049_v34, 7  ;;  %v3061_v17 = vsub.f32 %v4895_v38, %v3060_v35  ;;  %v3062_v53 = vsub.f32 %v4893_v44, %v3060_v35  ;;  %v3063_v52 = vsub.f32 %v4908_v18, %v3060_v35  ;;  %v3959_v44 = vld [vmem:[%s5071_s0] sm:$0xff]  ;;  %v3961_v18 = vld [vmem:[%s5071_s0 + $0x10] sm:$0xff] }
 0x66c   :  { %v3064_v58 = vsub.f32 %v4903_v0, %v3060_v35 }
 0x66d   :  { %v3053_v48 = vsub.f32 %v3046_v27, %v3051_v3 }
 0x66f   :  { %v3054_v8 = vmax.f32 %v3053_v48, 0.0 }
 0x671   :  { %v3055_v25 = vadd.f32 1e-05, %v3054_v8 }
 0x673   :  { %3957 = vrsqrt.f32 %v3055_v25 }
 0x680   :  { %v3958_v4 = vpop.eup %3957 }
 0x681   :  { %v3072_v5 = vmul.f32 %v3958_v4, %v3166_v22 }
 0x683   :  { %v3076_v39 = vrot.slane %v3072_v5, %v1609_v2 }
 0x685   :  { %v3077_v14 = vmul.f32 %v3076_v39, %v3061_v17  ;;  %v3078_v40 = vmul.f32 %v3076_v39, %v3062_v53  ;;  %v3079_v41 = vmul.f32 %v3076_v39, %v3063_v52  ;;  %v3080_v55 = vmul.f32 %v3076_v39, %v3064_v58 }
 0x687   :  { %v3088_v47 = vadd.f32 %v3167_v10, %v3077_v14  ;;  %v3089_v16 = vadd.f32 %v3167_v10, %v3078_v40  ;;  %v3090_v38 = vadd.f32 %v3167_v10, %v3079_v41  ;;  %v3091_v62 = vadd.f32 %v3167_v10, %v3080_v55 }
 0x689   :  { %v3092_v0 = vadd.f32 %v3959_v44, %v3088_v47  ;;  %v3093_v2 = vadd.f32 %v3960_v7, %v3089_v16  ;;  %v3094_v1 = vadd.f32 %v3961_v18, %v3090_v38  ;;  %v3095_v11 = vadd.f32 %v3962_v6, %v3091_v62 }
 0x68b   :  { %3096 = vst.msk [vmem:[%s5081_s11] sm:$0xff] %vm146_vm2, %v3092_v0  ;;  %3097 = vst.msk [vmem:[%s5081_s11 + $0x8] sm:$0xff] %vm146_vm2, %v3093_v2 }
 0x68c   :  { %3098 = vst.msk [vmem:[%s5081_s11 + $0x10] sm:$0xff] %vm146_vm2, %v3094_v1  ;;  %3099 = vst.msk [vmem:[%s5081_s11 + $0x18] sm:$0xff] %vm146_vm2, %v3095_v11 }

</bundles_post_ra>
